<compile_context>
chip_gen: v7x
topology: tpu7x:2x2x1
jax: 0.10.0
libtpu: 0.0.40
codegen_flags: <defaults>
</compile_context>

<pallas_src>
import functools

import jax
import jax.numpy as jnp
from jax.experimental import pallas as pl
from jax.experimental.pallas import tpu as pltpu


P = 128           # padded feature width (lane-dense)
N_LAYERS = 8


def _round_up(v, m):
    return ((v + m - 1) // m) * m


# ---------------------------------------------------------------------------
# Kernel
# ---------------------------------------------------------------------------
def _unet7_kernel(x_ref, w_ref, b_ref, o_ref, *, n_in):
    """x_ref: (TB, n_in) f32 | w_ref: (8, P, P) bf16 | b_ref: (8, P) f32 | o_ref: (TB, P) f32."""

    def lin(t_bf16, i, w=None):
        wi = w_ref[i] if w is None else w
        return jnp.dot(t_bf16, wi, preferred_element_type=jnp.float32) + b_ref[i]

    def relu(t):
        return jnp.maximum(t, 0.0)          # nn.ReLU (f32 on the VPU)

    def bf16(t):
        return t.astype(jnp.bfloat16)

    x_bf = bf16(x_ref[...])                  # (TB, n_in): cast f32 -> bf16 in-kernel
    w1 = w_ref[0, :n_in, :]                  # only the meaningful rows of fc1's weight

    out1 = bf16(relu(lin(x_bf, 0, w1)))      # fc1  (skip -> fc8), stored bf16
    out2 = bf16(relu(lin(out1, 1)))          # fc2  (skip -> fc7), stored bf16
    out3 = bf16(relu(lin(out2, 2)))          # fc3  (skip -> fc6), stored bf16
    h = bf16(relu(lin(out3, 3)))             # fc4
    h = relu(lin(h, 4))                      # fc5 (f32)
    h = bf16(h + out3.astype(jnp.float32))   # skip add in f32, bf16 into MXU
    h = relu(lin(h, 5))                      # fc6
    h = bf16(h + out2.astype(jnp.float32))
    h = relu(lin(h, 6))                      # fc7
    h = bf16(h + out1.astype(jnp.float32))
    o_ref[...] = lin(h, 7).astype(o_ref.dtype)   # fc8 (no activation)


# ---------------------------------------------------------------------------
# Parameter packing
# ---------------------------------------------------------------------------
def _pack_params(weights, biases):
    """Stack + zero-pad: weights -> (8, P, P) bf16, biases -> (8, P) f32. Exact padding."""
    w_stack = jnp.zeros((N_LAYERS, P, P), jnp.float32)
    b_stack = jnp.zeros((N_LAYERS, P), jnp.float32)
    for i, (w, b) in enumerate(zip(weights, biases)):
        d_in, d_out = w.shape
        w_stack = w_stack.at[i, :d_in, :d_out].set(w)
        b_stack = b_stack.at[i, :d_out].set(b.reshape(-1))
    return w_stack.astype(jnp.bfloat16), b_stack


def _choose_tb(B):
    # Big tiles to fill the MXU M dimension and amortize per-step overhead,
    # but keep >= 2 grid steps when possible (v7x: 2 TensorCores). 16-row
    # alignment keeps bf16 intermediates sublane-packed.
    return min(1024, _round_up(max(pl.cdiv(B, 2), 8), 16))


# ---------------------------------------------------------------------------
# Wrapper
# ---------------------------------------------------------------------------
def denoising_unet7_forward(x, weights, biases):
    """x: (B, N) f32. weights[i]: (in_i, out_i) f32. biases[i]: (1, out_i) f32."""
    B, N = x.shape

    # Keep the kernel's narrow input width a multiple of 8 sublanes (no-op for N=32).
    n_in = _round_up(N, 8)
    if n_in != N:
        x = jnp.pad(x, ((0, 0), (0, n_in - N)))

    TB = _choose_tb(B)
    B_pad = _round_up(B, TB)
    if B_pad != B:
        x = jnp.pad(x, ((0, B_pad - B), (0, 0)))
    grid = (B_pad // TB,)

    w_stack, b_stack = _pack_params(weights, biases)

    in_specs = [
        pl.BlockSpec((TB, n_in), lambda i: (i, 0)),          # input rows (raw f32)
        pl.BlockSpec((N_LAYERS, P, P), lambda i: (0, 0, 0)),  # grid-invariant weights
        pl.BlockSpec((N_LAYERS, P), lambda i: (0, 0)),        # grid-invariant biases
    ]
    out_specs = pl.BlockSpec((TB, P), lambda i: (i, 0))

    # Explicit VMEM budget: double-buffered x/out blocks + stacked params + headroom
    # for live intermediates; floor at 32 MiB (safe on v5e/v6e/v7x), cap below v7x physical.
    vmem_est = (2 * TB * n_in * 4
                + 2 * TB * P * 4
                + 2 * (N_LAYERS * P * P * 2 + N_LAYERS * P * 4)
                + 8 * TB * P * 4)
    vmem_limit = int(min(max(2 * vmem_est, 32 * 1024 * 1024), 48 * 1024 * 1024))

    flops = 2 * B_pad * N_LAYERS * P * P
    bytes_accessed = (B_pad * n_in * 4                       # x (f32)
                      + N_LAYERS * (P * P * 2 + P * 4)       # weights (bf16) + biases (f32)
                      + B_pad * P * 4)                       # output (f32)

    out_pad = pl.pallas_call(
        functools.partial(_unet7_kernel, n_in=n_in),
        out_shape=jax.ShapeDtypeStruct((B_pad, P), jnp.float32),
        grid_spec=pltpu.PrefetchScalarGridSpec(
            num_scalar_prefetch=0,
            grid=grid,
            in_specs=in_specs,
            out_specs=out_specs,
        ),
        compiler_params=pltpu.CompilerParams(
            dimension_semantics=("parallel",),
            vmem_limit_bytes=vmem_limit,
        ),
        cost_estimate=pl.CostEstimate(
            flops=flops, transcendentals=0, bytes_accessed=bytes_accessed),
    )(x, w_stack, b_stack)

    return out_pad[:B, :N]


# ---------------------------------------------------------------------------
# References
# ---------------------------------------------------------------------------
def _reference_forward_kernel_numerics(x, weights, biases):
    """Pure-JAX reference with the SAME bf16/f32 compute pattern as the kernel."""
    N = x.shape[1]
    w_stack, b_stack = _pack_params(weights, biases)

    def lin(t, i, w=None):
        wi = w_stack[i] if w is None else w
        return jnp.dot(t, wi, preferred_element_type=jnp.float32) + b_stack[i]

    relu = lambda t: jnp.maximum(t, 0.0)
    bf16 = lambda t: t.astype(jnp.bfloat16)

    x_bf = bf16(x)
    out1 = bf16(relu(lin(x_bf, 0, w_stack[0, :N, :])))
    out2 = bf16(relu(lin(out1, 1)))
    out3 = bf16(relu(lin(out2, 2)))
    h = bf16(relu(lin(out3, 3)))
    h = relu(lin(h, 4))
    h = bf16(h + out3.astype(jnp.float32))
    h = relu(lin(h, 5))
    h = bf16(h + out2.astype(jnp.float32))
    h = relu(lin(h, 6))
    h = bf16(h + out1.astype(jnp.float32))
    return lin(h, 7)[:, :N]


def _reference_forward_f32(x, weights, biases):
    """Full-precision unpadded reference (semantic check against the PyTorch module)."""
    act = lambda t: jnp.maximum(t, 0.0)
    lin = lambda t, i: t @ weights[i] + biases[i]
    out1 = act(lin(x, 0))
    out2 = act(lin(out1, 1))
    out3 = act(lin(out2, 2))
    h = act(lin(out3, 3))
    h = act(lin(h, 4))
    h = act(lin(h + out3, 5))
    h = act(lin(h + out2, 6))
    return lin(h + out1, 7)


def _init_params(key, N, n_units):
    """Deterministic init mimicking torch.nn.Linear (uniform +/- 1/sqrt(fan_in)).

    Weights stored in (in, out) layout (transposed from torch's (out, in)),
    biases with shape (1, out).
    """
    dims_in = [N] + list(n_units)
    dims_out = list(n_units) + [N]
    weights, biases = [], []
    for d_in, d_out in zip(dims_in, dims_out):
        key, kw, kb = jax.random.split(key, 3)
        bound = 1.0 / jnp.sqrt(d_in)
        w = jax.random.uniform(kw, (d_in, d_out), jnp.float32, -bound, bound)
        b = jax.random.uniform(kb, (1, d_out), jnp.float32, -bound, bound)
        weights.append(w)
        biases.append(b)
    return weights, biases


if __name__ == "__main__":
    # Shapes consistent with the module: N features, 7 hidden widths arranged so the
    # U-Net skip connections are dimension-compatible:
    #   n_units[4] == n_units[2], n_units[5] == n_units[1], n_units[6] == n_units[0]
    N = 32
    n_units = [64, 48, 32, 24, 32, 48, 64]
    B = 256           # -> TB=128, 2 "parallel" grid steps (exercises pipeline + v7x 2-TC split)
    alpha = 0.0       # dropout disabled -> deterministic forward

    key = jax.random.PRNGKey(0)
    key, kx = jax.random.split(key)
    x = jax.random.normal(kx, (B, N), dtype=jnp.float32)

    weights, biases = _init_params(key, N, n_units)

    out = denoising_unet7_forward(x, weights, biases)
    out = jax.block_until_ready(out)
    assert out.shape == (B, N)

    # Tight check against a reference with the identical bf16/f32 compute pattern.
    ref_k = _reference_forward_kernel_numerics(x, weights, biases)
    assert jnp.allclose(out, ref_k, atol=2e-3, rtol=2e-3), "mismatch vs bf16 reference"

    # Loose semantic check against the full-f32 unpadded forward (bf16 MXU rounding).
    ref_f32 = _reference_forward_f32(x, weights, biases)
    assert jnp.allclose(out, ref_f32, atol=1e-1, rtol=1e-1), "mismatch vs f32 reference"

    print("KERNEL_OK")
</pallas_src>

<mosaic_0001>
module attributes {stable_mosaic.version = 11 : i64} {
  func.func @_unet7_kernel(%arg0: i32, %arg1: memref<128x32xf32, #tpu.memory_space<vmem>>, %arg2: memref<8x128x128xbf16, #tpu.memory_space<vmem>>, %arg3: memref<8x128xf32, #tpu.memory_space<vmem>>, %arg4: memref<128x128xf32, #tpu.memory_space<vmem>>) attributes {dimension_semantics = [#tpu.dimension_semantics<parallel>], iteration_bounds = array<i64: 2>, scalar_prefetch = 0 : i64, scratch_operands = 0 : i64, tpu.core_type = #tpu.core_type<tc>, window_params = [{transform_indices = @transform_0, window_bounds = array<i64: 128, 32>}, {pipeline_mode = #tpu.pipeline_mode<synchronous>, transform_indices = @transform_1, window_bounds = array<i64: 8, 128, 128>}, {pipeline_mode = #tpu.pipeline_mode<synchronous>, transform_indices = @transform_2, window_bounds = array<i64: 8, 128>}, {transform_indices = @transform_3, window_bounds = array<i64: 128, 128>}]} {
    %c0 = arith.constant 0 : index
    %c0_0 = arith.constant 0 : index
    %0 = vector.load %arg1[%c0, %c0_0] : memref<128x32xf32, #tpu.memory_space<vmem>>, vector<128x32xf32>
    %1 = arith.truncf %0 : vector<128x32xf32> to vector<128x32xbf16>
    %c0_1 = arith.constant 0 : index
    %c0_2 = arith.constant 0 : index
    %c0_3 = arith.constant 0 : index
    %2 = vector.load %arg2[%c0_1, %c0_2, %c0_3] : memref<8x128x128xbf16, #tpu.memory_space<vmem>>, vector<1x32x128xbf16>
    %3 = vector.shape_cast %2 : vector<1x32x128xbf16> to vector<32x128xbf16>
    %cst = arith.constant dense<0.000000e+00> : vector<128x128xf32>
    %4 = tpu.matmul %1, %3, %cst {dimension_numbers = #tpu.dot_dimension_numbers<[1], [0], [0], [1], [0, 0, 1, 1], [], []>} : vector<128x32xbf16>, vector<32x128xbf16>, vector<128x128xf32> -> vector<128x128xf32>
    %c0_4 = arith.constant 0 : index
    %c0_5 = arith.constant 0 : index
    %5 = vector.load %arg3[%c0_4, %c0_5] : memref<8x128xf32, #tpu.memory_space<vmem>>, vector<1x128xf32>
    %6 = vector.shape_cast %5 : vector<1x128xf32> to vector<128xf32>
    %7 = vector.shape_cast %6 : vector<128xf32> to vector<1x128xf32>
    %8 = vector.broadcast %7 : vector<1x128xf32> to vector<128x128xf32>
    %9 = arith.addf %4, %8 : vector<128x128xf32>
    %cst_6 = arith.constant 0.000000e+00 : f32
    %10 = vector.broadcast %cst_6 : f32 to vector<128x128xf32>
    %11 = arith.maximumf %9, %10 : vector<128x128xf32>
    %12 = arith.truncf %11 : vector<128x128xf32> to vector<128x128xbf16>
    %c1 = arith.constant 1 : index
    %c0_7 = arith.constant 0 : index
    %c0_8 = arith.constant 0 : index
    %13 = vector.load %arg2[%c1, %c0_7, %c0_8] : memref<8x128x128xbf16, #tpu.memory_space<vmem>>, vector<1x128x128xbf16>
    %14 = vector.shape_cast %13 : vector<1x128x128xbf16> to vector<128x128xbf16>
    %cst_9 = arith.constant dense<0.000000e+00> : vector<128x128xf32>
    %15 = tpu.matmul %12, %14, %cst_9 {dimension_numbers = #tpu.dot_dimension_numbers<[1], [0], [0], [1], [0, 0, 1, 1], [], []>} : vector<128x128xbf16>, vector<128x128xbf16>, vector<128x128xf32> -> vector<128x128xf32>
    %c1_10 = arith.constant 1 : index
    %c0_11 = arith.constant 0 : index
    %16 = vector.load %arg3[%c1_10, %c0_11] : memref<8x128xf32, #tpu.memory_space<vmem>>, vector<1x128xf32>
    %17 = vector.shape_cast %16 : vector<1x128xf32> to vector<128xf32>
    %18 = vector.shape_cast %17 : vector<128xf32> to vector<1x128xf32>
    %19 = vector.broadcast %18 : vector<1x128xf32> to vector<128x128xf32>
    %20 = arith.addf %15, %19 : vector<128x128xf32>
    %cst_12 = arith.constant 0.000000e+00 : f32
    %21 = vector.broadcast %cst_12 : f32 to vector<128x128xf32>
    %22 = arith.maximumf %20, %21 : vector<128x128xf32>
    %23 = arith.truncf %22 : vector<128x128xf32> to vector<128x128xbf16>
    %c2 = arith.constant 2 : index
    %c0_13 = arith.constant 0 : index
    %c0_14 = arith.constant 0 : index
    %24 = vector.load %arg2[%c2, %c0_13, %c0_14] : memref<8x128x128xbf16, #tpu.memory_space<vmem>>, vector<1x128x128xbf16>
    %25 = vector.shape_cast %24 : vector<1x128x128xbf16> to vector<128x128xbf16>
    %cst_15 = arith.constant dense<0.000000e+00> : vector<128x128xf32>
    %26 = tpu.matmul %23, %25, %cst_15 {dimension_numbers = #tpu.dot_dimension_numbers<[1], [0], [0], [1], [0, 0, 1, 1], [], []>} : vector<128x128xbf16>, vector<128x128xbf16>, vector<128x128xf32> -> vector<128x128xf32>
    %c2_16 = arith.constant 2 : index
    %c0_17 = arith.constant 0 : index
    %27 = vector.load %arg3[%c2_16, %c0_17] : memref<8x128xf32, #tpu.memory_space<vmem>>, vector<1x128xf32>
    %28 = vector.shape_cast %27 : vector<1x128xf32> to vector<128xf32>
    %29 = vector.shape_cast %28 : vector<128xf32> to vector<1x128xf32>
    %30 = vector.broadcast %29 : vector<1x128xf32> to vector<128x128xf32>
    %31 = arith.addf %26, %30 : vector<128x128xf32>
    %cst_18 = arith.constant 0.000000e+00 : f32
    %32 = vector.broadcast %cst_18 : f32 to vector<128x128xf32>
    %33 = arith.maximumf %31, %32 : vector<128x128xf32>
    %34 = arith.truncf %33 : vector<128x128xf32> to vector<128x128xbf16>
    %c3 = arith.constant 3 : index
    %c0_19 = arith.constant 0 : index
    %c0_20 = arith.constant 0 : index
    %35 = vector.load %arg2[%c3, %c0_19, %c0_20] : memref<8x128x128xbf16, #tpu.memory_space<vmem>>, vector<1x128x128xbf16>
    %36 = vector.shape_cast %35 : vector<1x128x128xbf16> to vector<128x128xbf16>
    %cst_21 = arith.constant dense<0.000000e+00> : vector<128x128xf32>
    %37 = tpu.matmul %34, %36, %cst_21 {dimension_numbers = #tpu.dot_dimension_numbers<[1], [0], [0], [1], [0, 0, 1, 1], [], []>} : vector<128x128xbf16>, vector<128x128xbf16>, vector<128x128xf32> -> vector<128x128xf32>
    %c3_22 = arith.constant 3 : index
    %c0_23 = arith.constant 0 : index
    %38 = vector.load %arg3[%c3_22, %c0_23] : memref<8x128xf32, #tpu.memory_space<vmem>>, vector<1x128xf32>
    %39 = vector.shape_cast %38 : vector<1x128xf32> to vector<128xf32>
    %40 = vector.shape_cast %39 : vector<128xf32> to vector<1x128xf32>
    %41 = vector.broadcast %40 : vector<1x128xf32> to vector<128x128xf32>
    %42 = arith.addf %37, %41 : vector<128x128xf32>
    %cst_24 = arith.constant 0.000000e+00 : f32
    %43 = vector.broadcast %cst_24 : f32 to vector<128x128xf32>
    %44 = arith.maximumf %42, %43 : vector<128x128xf32>
    %45 = arith.truncf %44 : vector<128x128xf32> to vector<128x128xbf16>
    %c4 = arith.constant 4 : index
    %c0_25 = arith.constant 0 : index
    %c0_26 = arith.constant 0 : index
    %46 = vector.load %arg2[%c4, %c0_25, %c0_26] : memref<8x128x128xbf16, #tpu.memory_space<vmem>>, vector<1x128x128xbf16>
    %47 = vector.shape_cast %46 : vector<1x128x128xbf16> to vector<128x128xbf16>
    %cst_27 = arith.constant dense<0.000000e+00> : vector<128x128xf32>
    %48 = tpu.matmul %45, %47, %cst_27 {dimension_numbers = #tpu.dot_dimension_numbers<[1], [0], [0], [1], [0, 0, 1, 1], [], []>} : vector<128x128xbf16>, vector<128x128xbf16>, vector<128x128xf32> -> vector<128x128xf32>
    %c4_28 = arith.constant 4 : index
    %c0_29 = arith.constant 0 : index
    %49 = vector.load %arg3[%c4_28, %c0_29] : memref<8x128xf32, #tpu.memory_space<vmem>>, vector<1x128xf32>
    %50 = vector.shape_cast %49 : vector<1x128xf32> to vector<128xf32>
    %51 = vector.shape_cast %50 : vector<128xf32> to vector<1x128xf32>
    %52 = vector.broadcast %51 : vector<1x128xf32> to vector<128x128xf32>
    %53 = arith.addf %48, %52 : vector<128x128xf32>
    %cst_30 = arith.constant 0.000000e+00 : f32
    %54 = vector.broadcast %cst_30 : f32 to vector<128x128xf32>
    %55 = arith.maximumf %53, %54 : vector<128x128xf32>
    %56 = arith.extf %34 : vector<128x128xbf16> to vector<128x128xf32>
    %57 = arith.addf %55, %56 : vector<128x128xf32>
    %58 = arith.truncf %57 : vector<128x128xf32> to vector<128x128xbf16>
    %c5 = arith.constant 5 : index
    %c0_31 = arith.constant 0 : index
    %c0_32 = arith.constant 0 : index
    %59 = vector.load %arg2[%c5, %c0_31, %c0_32] : memref<8x128x128xbf16, #tpu.memory_space<vmem>>, vector<1x128x128xbf16>
    %60 = vector.shape_cast %59 : vector<1x128x128xbf16> to vector<128x128xbf16>
    %cst_33 = arith.constant dense<0.000000e+00> : vector<128x128xf32>
    %61 = tpu.matmul %58, %60, %cst_33 {dimension_numbers = #tpu.dot_dimension_numbers<[1], [0], [0], [1], [0, 0, 1, 1], [], []>} : vector<128x128xbf16>, vector<128x128xbf16>, vector<128x128xf32> -> vector<128x128xf32>
    %c5_34 = arith.constant 5 : index
    %c0_35 = arith.constant 0 : index
    %62 = vector.load %arg3[%c5_34, %c0_35] : memref<8x128xf32, #tpu.memory_space<vmem>>, vector<1x128xf32>
    %63 = vector.shape_cast %62 : vector<1x128xf32> to vector<128xf32>
    %64 = vector.shape_cast %63 : vector<128xf32> to vector<1x128xf32>
    %65 = vector.broadcast %64 : vector<1x128xf32> to vector<128x128xf32>
    %66 = arith.addf %61, %65 : vector<128x128xf32>
    %cst_36 = arith.constant 0.000000e+00 : f32
    %67 = vector.broadcast %cst_36 : f32 to vector<128x128xf32>
    %68 = arith.maximumf %66, %67 : vector<128x128xf32>
    %69 = arith.extf %23 : vector<128x128xbf16> to vector<128x128xf32>
    %70 = arith.addf %68, %69 : vector<128x128xf32>
    %71 = arith.truncf %70 : vector<128x128xf32> to vector<128x128xbf16>
    %c6 = arith.constant 6 : index
    %c0_37 = arith.constant 0 : index
    %c0_38 = arith.constant 0 : index
    %72 = vector.load %arg2[%c6, %c0_37, %c0_38] : memref<8x128x128xbf16, #tpu.memory_space<vmem>>, vector<1x128x128xbf16>
    %73 = vector.shape_cast %72 : vector<1x128x128xbf16> to vector<128x128xbf16>
    %cst_39 = arith.constant dense<0.000000e+00> : vector<128x128xf32>
    %74 = tpu.matmul %71, %73, %cst_39 {dimension_numbers = #tpu.dot_dimension_numbers<[1], [0], [0], [1], [0, 0, 1, 1], [], []>} : vector<128x128xbf16>, vector<128x128xbf16>, vector<128x128xf32> -> vector<128x128xf32>
    %c6_40 = arith.constant 6 : index
    %c0_41 = arith.constant 0 : index
    %75 = vector.load %arg3[%c6_40, %c0_41] : memref<8x128xf32, #tpu.memory_space<vmem>>, vector<1x128xf32>
    %76 = vector.shape_cast %75 : vector<1x128xf32> to vector<128xf32>
    %77 = vector.shape_cast %76 : vector<128xf32> to vector<1x128xf32>
    %78 = vector.broadcast %77 : vector<1x128xf32> to vector<128x128xf32>
    %79 = arith.addf %74, %78 : vector<128x128xf32>
    %cst_42 = arith.constant 0.000000e+00 : f32
    %80 = vector.broadcast %cst_42 : f32 to vector<128x128xf32>
    %81 = arith.maximumf %79, %80 : vector<128x128xf32>
    %82 = arith.extf %12 : vector<128x128xbf16> to vector<128x128xf32>
    %83 = arith.addf %81, %82 : vector<128x128xf32>
    %84 = arith.truncf %83 : vector<128x128xf32> to vector<128x128xbf16>
    %c7 = arith.constant 7 : index
    %c0_43 = arith.constant 0 : index
    %c0_44 = arith.constant 0 : index
    %85 = vector.load %arg2[%c7, %c0_43, %c0_44] : memref<8x128x128xbf16, #tpu.memory_space<vmem>>, vector<1x128x128xbf16>
    %86 = vector.shape_cast %85 : vector<1x128x128xbf16> to vector<128x128xbf16>
    %cst_45 = arith.constant dense<0.000000e+00> : vector<128x128xf32>
    %87 = tpu.matmul %84, %86, %cst_45 {dimension_numbers = #tpu.dot_dimension_numbers<[1], [0], [0], [1], [0, 0, 1, 1], [], []>} : vector<128x128xbf16>, vector<128x128xbf16>, vector<128x128xf32> -> vector<128x128xf32>
    %c7_46 = arith.constant 7 : index
    %c0_47 = arith.constant 0 : index
    %88 = vector.load %arg3[%c7_46, %c0_47] : memref<8x128xf32, #tpu.memory_space<vmem>>, vector<1x128xf32>
    %89 = vector.shape_cast %88 : vector<1x128xf32> to vector<128xf32>
    %90 = vector.shape_cast %89 : vector<128xf32> to vector<1x128xf32>
    %91 = vector.broadcast %90 : vector<1x128xf32> to vector<128x128xf32>
    %92 = arith.addf %87, %91 : vector<128x128xf32>
    %c0_48 = arith.constant 0 : index
    %c0_49 = arith.constant 0 : index
    %93 = vector.load %arg4[%c0_48, %c0_49] : memref<128x128xf32, #tpu.memory_space<vmem>>, vector<128x128xf32>
    tpu.vector_store %arg4[%c0_48, %c0_49], %92 {strides = array<i32>} : memref<128x128xf32, #tpu.memory_space<vmem>>, vector<128x128xf32>,
    return
  }
  func.func @transform_0(%arg0: i32) -> (i32, i32) {
    %c0_i32 = arith.constant 0 : i32
    %c0_i32_0 = arith.constant 0 : i32
    return %arg0, %c0_i32 : i32, i32
  }
  func.func @transform_1(%arg0: i32) -> (i32, i32, i32) {
    %c0_i32 = arith.constant 0 : i32
    %c0_i32_0 = arith.constant 0 : i32
    %c0_i32_1 = arith.constant 0 : i32
    %c0_i32_2 = arith.constant 0 : i32
    return %c0_i32, %c0_i32_0, %c0_i32_1 : i32, i32, i32
  }
  func.func @transform_2(%arg0: i32) -> (i32, i32) {
    %c0_i32 = arith.constant 0 : i32
    %c0_i32_0 = arith.constant 0 : i32
    %c0_i32_1 = arith.constant 0 : i32
    return %c0_i32, %c0_i32_0 : i32, i32
  }
  func.func @transform_3(%arg0: i32) -> (i32, i32) {
    %c0_i32 = arith.constant 0 : i32
    %c0_i32_0 = arith.constant 0 : i32
    return %arg0, %c0_i32 : i32, i32
  }
}

</mosaic_0001>

<bundles_post_ra>
// kernel: tpu_custom_call.1
= control target key start
LH: loop header
LB: loop body
LE: loop exit
PB: predicated region body
PF: predicated region fallthrough
CT: control target
= control target key end

     0   :  { %8 = vsyncpa [#allocation3], 0  ;;  %s3005_s0 = inlined_call_operand.vmem [shape: f32[256,32], index: 0, kind: input, shape index: {}]   ;;  %s3006_s1 = inlined_call_operand.hbm [shape: bf16[8,128,128], index: 1, kind: input, shape index: {}]   ;;  %s3007_s2 = inlined_call_operand.vmem [shape: f32[8,128], index: 2, kind: input, shape index: {}]   ;;  %s3008_s3 = inlined_call_operand.hbm [shape: f32[256,128], index: 3, kind: output, shape index: {}]  }
   0x1   :  { %9 = vsyncpa [#allocation4], 0 }
   0x2   :  { %11 = vsyncpa [#allocation4 + $0x1], 0  ;;  %s2597_s12 = smov 0   ;;  %s2599_s13 = smov 0  }
   0x3   :  { %s2601_s14 = smov 0   ;;  %s2603_s15 = smov 0  }
   0x4 LB: > { %s2618_s16 = sadd.s32 4294967295, %s2569_s15   ;;  %s1892_s17 = sadd.s32 4294967294, %s2569_s15   ;;  %s2569_s15 = sphi %s2603_s15, %s3024_s15   ;;  %s2565_s14 = sphi %s2601_s14, %s3023_s14   ;;  %s2561_s13 = sphi %s2599_s13, %s3022_s13   ;;  %s2557_s12 = sphi %s2597_s12, %s3021_s12  }
   0x5   : > { %s2622_s18 = sadd.s32 1, %s2569_s15   ;;  %s92_s19 = sadd.s32 1, %s2565_s14 }
   0x6   : > { %s89_s20 = ssub.s32 %s2569_s15, %s2622_s18  ;;  %p102_p0 = scmp.ne.s32.totalorder %s2565_s14, %s2561_s13 }
   0x7   : > { %p90_p1 = scmp.eq.s32.totalorder %s89_s20, 0  ;;  %p103_p2 = scmp.eq.s32.totalorder %s2618_s16, 1 }
   0x8   : > { %p108_p3 = scmp.ne.s32.totalorder %s2561_s13, %s2557_s12  ;;  %p109_p4 = scmp.eq.s32.totalorder %s1892_s17, 1 }
   0x9   : > { %s2633_s21 = scalar_select %p90_p1, %s2565_s14, %s92_s19  }
   0xa   : > { %p2635_p5 = por %p103_p2, %p102_p0  ;;  %p2639_p6 = por %p109_p4, %p108_p3 }
   0xb   : > { %p1893_p7 = scmp.ge.s32.totalorder %s2569_s15, 1  ;;  %p116_p8 = scmp.lt.s32.totalorder %s2569_s15, 3 }
   0xc   : > { %s3012_s22 = scalar_select %p2635_p5, 1, 0 }
   0xd   : > { %s3013_s23 = scalar_select %p2639_p6, 1, 0 }
   0xe   : > { %p3009_p9 = scmp.eq.s32.totalorder %s2618_s16, 0  ;;  %p2646_p10 = pnand %p1893_p7, %p116_p8 }
   0xf   : > { %s2571_s25 = smov [#allocation2]   ;;  %s2475_s30 = scalar_lea.hbm %s3006_s1, 8192 }
  0x10   : > { %s3014_s24 = scalar_select %p2646_p10, 1, 0 }
  0x11   : > { %s128_s26 = sshll.u32 %s2571_s25, 4  ;;  %p2369_p11 = pneg %p2646_p10  ;;  %s129_s26 = int_to_ptr.vmem [resolvable:$true] %s128_s26 }
  0x12   : > { %p2476_p13 = scmp.ne.s32.totalorder %s3006_s1, %s2475_s30  ;;  %p2482_p3 = scmp.lt.u32.totalorder %s2475_s30, %s3006_s1 }
  0x13   : > { %p2654_p12 = pnand %p3009_p9, %p2369_p11 }
  0x15   : > { %p2477_p0 = pneg %p2654_p12 }
  0x17   : > { %p2478_p1 = pnand %p2477_p0, %p2476_p13 }
  0x19   : > { %p2479_p2 = pneg %p2478_p1 }
  0x1b   : > { %p2484_p4 = pnand %p2482_p3, %p2479_p2 }
  0x1d   : > { %2487 = shalt.err (!%p2484_p4)
}
  0x1e   : > { %s2488_s8 = scalar_lea.vmem %s129_s26, 8192  ;;  %p2496_p9 = scmp.lt.s32.totalorder %s129_s26, %s129_s26 }
  0x1f   : > { %p2489_p7 = scmp.ne.s32.totalorder %s129_s26, %s2488_s8  ;;  %p2497_p6 = scmp.lt.s32.totalorder %s2488_s8, %s2488_s8 }
  0x21   : > { %p2491_p8 = pnand %p2489_p7, %p2477_p0  ;;  %p2498_p5 = por %p2497_p6, %p2496_p9 }
  0x23   : > { %p2492_p11 = pneg %p2491_p8 }
  0x25   : > { %p2499_p10 = pnand %p2498_p5, %p2492_p11 }
  0x27   : > { %2502 = shalt.err (!%p2499_p10)
}
  0x28   : > { %s2572_s9 = smov 64   ;;  %s2573_s10 = smov 4  }
  0x29   : > { %2372 = dma.hbm_to_vmem [thread:$0]  (!%p2654_p12), %s3006_s1, 8192, %s129_s26, [#allocation3], %s2572_s9, %s2572_s9, %s2573_s10  }
  0x2a   : > { %p3016_p13 = scmp.ne.s32.totalorder %s3014_s24, 0 }
  0x2b   : > { %p3017_p1 = scmp.eq.s32.totalorder (!%p3016_p13), %s2618_s16, 0 }
  0x2c   : > { %156 = sbr.rel (%p3016_p13) target bundleno = 1878 (0x756), region = 32 }
  0x33   : > { %2548 = dma.done.wait (%p3017_p1), [#allocation3], 8192   ;;  %p3018_p0 = pmov %p3017_p1 }
  0x34   : > { %s1899_s19 = sshll.u32 %s2618_s16, 4  ;;  %v2417_v0 = vld [vmem:[#allocation2] sm:$0xff]   ;;  %v2418_v1 = vld [vmem:[#allocation2 + $0x8] sm:$0xff]   ;;  %vm233_vm0 = vcmask 261120   ;;  %v2421_v17 = vld [vmem:[#allocation2 + $0x50] sm:$0xff]   ;;  %s1980_s26 = sshll.u32 %s2618_s16, 11 }
  0x35   : > { %2550 = vsyncadd (%p3018_p0), [#allocation3], 4294959104  ;;  %p181_p5 = scmp.lt.s32.totalorder %s1899_s19, 31  ;;  %2103 = vmatprep.subr.bf16.mxu0 %v2417_v0  ;;  %v2419_v11 = vld [vmem:[#allocation2 + $0x40] sm:$0xff]   ;;  %v2420_v14 = vld [vmem:[#allocation2 + $0x48] sm:$0xff]   ;;  %s2955_s5 = scalar_lea.hbm %s3008_s3, %s1980_s26 }
  0x36   : > { %2104 = vmatpush3.bf16.msra.mxu0 %v2417_v0  ;;  %2123 = vmatprep.subr.bf16.mxu1 %v2419_v11  ;;  %v2422_v19 = vld [vmem:[#allocation2 + $0x58] sm:$0xff]   ;;  %v2423_v25 = vld [vmem:[#allocation2 + $0x60] sm:$0xff]   ;;  %v2424_v27 = vld [vmem:[#allocation2 + $0x68] sm:$0xff]   ;;  %p3019_p9 = scmp.ne.s32.totalorder %s3012_s22, 0  ;;  %s2574_s7 = smov [#allocation5]  }
  0x37   : > { %s3026_s19 = smov (!%p181_p5, %s1899_s19), 31  ;;  %2105 = vmatprep.subr.bf16.mxu0 %v2418_v1  ;;  %2124 = vmatpush3.bf16.msra.mxu1 %v2419_v11  ;;  %v2425_v32 = vld [vmem:[#allocation2 + $0x70] sm:$0xff]   ;;  %v2426_v33 = vld [vmem:[#allocation2 + $0x78] sm:$0xff]   ;;  %v2427_v34 = vld [vmem:[#allocation2 + $0x80] sm:$0xff]   ;;  %s2507_s8 = sshll.u32 %s2574_s7, 4  ;;  %s2508_s8 = int_to_ptr.vmem [resolvable:$false] %s2507_s8 }
  0x38   : > { %s1900_s20 = sshll.u32 %s3026_s19, 3  ;;  %2125 = vmatprep.subr.bf16.mxu1 %v2420_v14  ;;  %v2428_v35 = vld [vmem:[#allocation2 + $0x88] sm:$0xff]   ;;  %v2429_v36 = vld [vmem:[#allocation2 + $0x90] sm:$0xff]   ;;  %v2430_v37 = vld [vmem:[#allocation2 + $0x98] sm:$0xff]   ;;  %s2509_s9 = scalar_lea.vmem %s2508_s8, 4096 }
  0x39   : > { %s2684_s28 = scalar_lea.vmem %s3005_s0, %s1900_s20  ;;  %v2431_v38 = vld [vmem:[#allocation2 + $0xa0] sm:$0xff]   ;;  %v2432_v39 = vld [vmem:[#allocation2 + $0xa8] sm:$0xff]   ;;  %s177_s20 = sand.u32 1, %s2561_s13  }
  0x3a   : > { %v188_v2 = vld [vmem:[%s2684_s28] sm:$0xff]  ;;  %v189_v3 = vld [vmem:[%s2684_s28 + $0x8] sm:$0xff]  ;;  %v190_v5 = vld [vmem:[%s2684_s28 + $0x10] sm:$0xff]  ;;  %2106 = vmatpush3.bf16.msra.mxu0 %v2418_v1  ;;  %s1898_s25 = sshll.u32 %s177_s20, 7  ;;  %s2964_s16 = scalar_lea.sflag [#allocation4], %s177_s20 }
  0x3b   : > { %v204_v4 = vpack.c.bf16 %v189_v3, %v188_v2  ;;  %v191_v6 = vld [vmem:[%s2684_s28 + $0x18] sm:$0xff]  ;;  %v192_v7 = vld [vmem:[%s2684_s28 + $0x20] sm:$0xff]  ;;  %v193_v8 = vld [vmem:[%s2684_s28 + $0x28] sm:$0xff]  ;;  %2126 = vmatpush3.bf16.msra.mxu1 %v2420_v14  ;;  %2155 = vmatprep.subr.bf16.mxu0 %v2427_v34  ;;  %s2935_s24 = scalar_lea.vmem [#allocation5], %s1898_s25 }
  0x3c   : > { %v205_v9 = vpack.c.bf16 %v191_v6, %v190_v5  ;;  %v206_v10 = vpack.c.bf16 %v193_v8, %v192_v7  ;;  %v194_v12 = vld [vmem:[%s2684_s28 + $0x30] sm:$0xff]  ;;  %v195_v13 = vld [vmem:[%s2684_s28 + $0x38] sm:$0xff]  ;;  %v196_v15 = vld [vmem:[%s2684_s28 + $0x40] sm:$0xff]  ;;  %2127 = vmatprep.subr.bf16.mxu1 %v2421_v17  ;;  %s1818_s29 = sshll.u32 %s2935_s24, 4  ;;  %s2957_s29 = int_to_ptr.vmem [resolvable:$true] %s1818_s29 }
  0x3d   : > { %2107 = vmatprep.mubr.msk.bf16.mxu0 %vm233_vm0, %v204_v4  ;;  %v197_v16 = vld [vmem:[%s2684_s28 + $0x48] sm:$0xff]  ;;  %v207_v18 = vpack.c.bf16 %v195_v13, %v194_v12  ;;  %v198_v21 = vld [vmem:[%s2684_s28 + $0x50] sm:$0xff]  ;;  %v199_v22 = vld [vmem:[%s2684_s28 + $0x58] sm:$0xff]  ;;  %s2503_s6 = scalar_lea.vmem %s2957_s29, 2048  ;;  %p2510_p2 = scmp.lt.s32.totalorder %s2957_s29, %s2508_s8 }
  0x3e   : > { %2108 = vmatmul.mubr.msk.bf16.vlgmr.msra.gmra.mrb[0].mxu0 %vm233_vm0, %v205_v9  ;;  %v208_v20 = vpack.c.bf16 %v197_v16, %v196_v15  ;;  %v200_v23 = vld [vmem:[%s2684_s28 + $0x60] sm:$0xff]  ;;  %v201_v24 = vld [vmem:[%s2684_s28 + $0x68] sm:$0xff]  ;;  %v209_v26 = vpack.c.bf16 %v199_v22, %v198_v21  ;;  %v202_v29 = vld [vmem:[%s2684_s28 + $0x70] sm:$0xff]  ;;  %p2504_p6 = scmp.ne.s32.totalorder %s2957_s29, %s2503_s6  ;;  %p2511_p3 = scmp.lt.s32.totalorder %s2509_s9, %s2503_s6 }
  0x3f   : > { %2111 = vmatprep.mubr.msk.bf16.mxu0 %vm233_vm0, %v206_v10  ;;  %2128 = vmatpush3.bf16.msra.mxu1 %v2421_v17  ;;  %v210_v28 = vpack.c.bf16 %v201_v24, %v200_v23  ;;  %v203_v30 = vld [vmem:[%s2684_s28 + $0x78] sm:$0xff]  ;;  %v1901_v40 = vld [vmem:[%s3007_s2] ss:$0 sm:$0xff] }
  0x40   : > { %2129 = vmatprep.subr.bf16.mxu1 %v2422_v19  ;;  %v211_v31 = vpack.c.bf16 %v203_v30, %v202_v29  ;;  %2156 = vmatpush3.bf16.msra.mxu0 %v2427_v34  ;;  %v2434_v34 = vld [vmem:[#allocation2 + $0xb8] sm:$0xff]   ;;  %p2505_p10 = pnand %p2504_p6, %p3019_p9  ;;  %p2512_p4 = por %p2511_p3, %p2510_p2 }
  0x41   : > { %2157 = vmatprep.subr.bf16.mxu0 %v2428_v35 }
  0x42   : > { %p2506_p12 = pneg %p2505_p10 }
  0x43   : > { %2130 = vmatpush3.bf16.msra.mxu1 %v2422_v19 }
  0x44   : > { %2131 = vmatprep.subr.bf16.mxu1 %v2423_v25  ;;  %2158 = vmatpush3.bf16.msra.mxu0 %v2428_v35  ;;  %v2435_v35 = vld [vmem:[#allocation2 + $0xc0] sm:$0xff]   ;;  %p2513_p7 = pnand %p2512_p4, %p2506_p12 }
  0x45   : > { %2159 = vmatprep.subr.bf16.mxu0 %v2429_v36 }
  0x46   : > { %2112 = vmatmul.mubr.msk.bf16.gmra.mrb[4].mxu0 %vm233_vm0, %v207_v18 }
  0x47   : > { %2115 = vmatprep.mubr.msk.bf16.mxu0 %vm233_vm0, %v208_v20  ;;  %2132 = vmatpush3.bf16.msra.mxu1 %v2423_v25 }
  0x48   : > { %2133 = vmatprep.subr.bf16.mxu1 %v2424_v27  ;;  %2160 = vmatpush3.bf16.msra.mxu0 %v2429_v36  ;;  %v2436_v36 = vld [vmem:[#allocation2 + $0xc8] sm:$0xff]  }
  0x49   : > { %2161 = vmatprep.subr.bf16.mxu0 %v2430_v37 }
  0x4b   : > { %2134 = vmatpush3.bf16.msra.mxu1 %v2424_v27 }
  0x4c   : > { %2135 = vmatprep.subr.bf16.mxu1 %v2425_v32  ;;  %2162 = vmatpush3.bf16.msra.mxu0 %v2430_v37  ;;  %v2437_v37 = vld [vmem:[#allocation2 + $0xd0] sm:$0xff]  }
  0x4d   : > { %2163 = vmatprep.subr.bf16.mxu0 %v2431_v38 }
  0x4e   : > { %2116 = vmatmul.mubr.msk.bf16.gmra.mrb[8].mxu0 %vm233_vm0, %v209_v26 }
  0x4f   : > { %2119 = vmatprep.mubr.msk.bf16.mxu0 %vm233_vm0, %v210_v28  ;;  %2136 = vmatpush3.bf16.msra.mxu1 %v2425_v32 }
  0x50   : > { %2137 = vmatprep.subr.bf16.mxu1 %v2426_v33  ;;  %2164 = vmatpush3.bf16.msra.mxu0 %v2431_v38  ;;  %v2438_v38 = vld [vmem:[#allocation2 + $0xd8] sm:$0xff]  }
  0x51   : > { %2165 = vmatprep.subr.bf16.mxu0 %v2432_v39 }
  0x53   : > { %2138 = vmatpush3.bf16.msra.mxu1 %v2426_v33  ;;  %v2433_v33 = vld [vmem:[#allocation2 + $0xb0] sm:$0xff]  }
  0x54   : > { %2166 = vmatpush3.bf16.msra.mxu0 %v2432_v39  ;;  %2187 = vmatprep.subr.bf16.mxu1 %v2435_v35  ;;  %v2439_v39 = vld [vmem:[#allocation2 + $0xe0] sm:$0xff]  }
  0x55   : > { %2167 = vmatprep.subr.bf16.mxu0 %v2433_v33 }
  0x56   : > { %2120 = vmatmul.mubr.msk.bf16.gmra.mrb[12].mxu0 %vm233_vm0, %v211_v31 }
  0x58   : > { %2168 = vmatpush3.bf16.msra.mxu0 %v2433_v33 }
  0x59   : > { %2169 = vmatprep.subr.bf16.mxu0 %v2434_v34 }
  0x5c   : > { %2170 = vmatpush3.bf16.msra.mxu0 %v2434_v34 }
 0x111   : > { %v2109_v41 = vpop.f32.mrb[0].mxu0 }
 0x112   : > { %v301_v42 = vadd.f32 %v2109_v41, %v1901_v40  ;;  %v292_v43 = vpop.f32.mrb[1].mxu0  ;;  %v1912_v41 = vld [vmem:[%s3007_s2 + $0x1] ss:$0 sm:$0xff] }
 0x113   : > { %v293_v44 = vadd.f32 %v1901_v40, %v292_v43  ;;  %v2110_v45 = vpop.f32.mrb[2].mxu0 }
 0x114   : > { %v304_v46 = vadd.f32 %v2110_v45, %v1901_v40  ;;  %v295_v47 = vpop.f32.mrb[3].mxu0  ;;  %v357_v49 = vmax.f32 %v301_v42, 0.0 }
 0x115   : > { %v296_v48 = vadd.f32 %v1901_v40, %v295_v47  ;;  %v355_v51 = vmax.f32 %v293_v44, 0.0 }
 0x116   : > { %v358_v50 = vmax.f32 %v304_v46, 0.0 }
 0x117   : > { %v356_v52 = vmax.f32 %v296_v48, 0.0 }
 0x118   : > { %v2713_v53 = vpack.c.bf16 %v358_v50, %v357_v49 }
 0x119   : > { %v2715_v54 = vpack.c.bf16 %v356_v52, %v355_v51  ;;  %v2113_v55 = vpop.f32.mrb[4].mxu0 }
 0x11a   : > { %v317_v56 = vadd.f32 %v2113_v55, %v1901_v40  ;;  %v308_v57 = vpop.f32.mrb[5].mxu0 }
 0x11b   : > { %v309_v58 = vadd.f32 %v1901_v40, %v308_v57  ;;  %v2114_v59 = vpop.f32.mrb[6].mxu0  ;;  %2139 = vmatprep.mubr.bf16.mxu1 %v2715_v54 }
 0x11c   : > { %v320_v60 = vadd.f32 %v2114_v59, %v1901_v40  ;;  %v311_v61 = vpop.f32.mrb[7].mxu0  ;;  %2140 = vmatmul.mubr.bf16.vlgmr.msra.gmra.mrb[0].mxu1 %v2713_v53  ;;  %v361_v63 = vmax.f32 %v317_v56, 0.0 }
 0x11d   : > { %v312_v62 = vadd.f32 %v1901_v40, %v311_v61  ;;  %v359_v1 = vmax.f32 %v309_v58, 0.0  ;;  %2188 = vmatpush3.bf16.msra.mxu1 %v2435_v35 }
 0x11e   : > { %v362_v0 = vmax.f32 %v320_v60, 0.0  ;;  %2189 = vmatprep.subr.bf16.mxu1 %v2436_v36 }
 0x11f   : > { %v360_v2 = vmax.f32 %v312_v62, 0.0 }
 0x120   : > { %v2719_v3 = vpack.c.bf16 %v362_v0, %v361_v63 }
 0x121   : > { %v2721_v4 = vpack.c.bf16 %v360_v2, %v359_v1  ;;  %v2117_v5 = vpop.f32.mrb[8].mxu0  ;;  %2190 = vmatpush3.bf16.msra.mxu1 %v2436_v36 }
 0x122   : > { %v333_v6 = vadd.f32 %v2117_v5, %v1901_v40  ;;  %v324_v7 = vpop.f32.mrb[9].mxu0  ;;  %2191 = vmatprep.subr.bf16.mxu1 %v2437_v37 }
 0x123   : > { %v325_v8 = vadd.f32 %v1901_v40, %v324_v7  ;;  %v2118_v9 = vpop.f32.mrb[10].mxu0  ;;  %2143 = vmatprep.mubr.bf16.mxu1 %v2721_v4 }
 0x124   : > { %v336_v10 = vadd.f32 %v2118_v9, %v1901_v40  ;;  %v327_v11 = vpop.f32.mrb[11].mxu0  ;;  %2144 = vmatmul.mubr.bf16.gmra.mrb[4].mxu1 %v2719_v3  ;;  %v365_v13 = vmax.f32 %v333_v6, 0.0 }
 0x125   : > { %v328_v12 = vadd.f32 %v1901_v40, %v327_v11  ;;  %v363_v15 = vmax.f32 %v325_v8, 0.0  ;;  %2192 = vmatpush3.bf16.msra.mxu1 %v2437_v37 }
 0x126   : > { %v366_v14 = vmax.f32 %v336_v10, 0.0  ;;  %2193 = vmatprep.subr.bf16.mxu1 %v2438_v38 }
 0x127   : > { %v364_v16 = vmax.f32 %v328_v12, 0.0 }
 0x128   : > { %v2725_v17 = vpack.c.bf16 %v366_v14, %v365_v13 }
 0x129   : > { %v2727_v18 = vpack.c.bf16 %v364_v16, %v363_v15  ;;  %v2121_v19 = vpop.f32.mrb[12].mxu0  ;;  %2194 = vmatpush3.bf16.msra.mxu1 %v2438_v38 }
 0x12a   : > { %v349_v20 = vadd.f32 %v2121_v19, %v1901_v40  ;;  %v340_v21 = vpop.f32.mrb[13].mxu0  ;;  %2195 = vmatprep.subr.bf16.mxu1 %v2439_v39 }
 0x12b   : > { %v341_v22 = vadd.f32 %v1901_v40, %v340_v21  ;;  %v2122_v23 = vpop.f32.mrb[14].mxu0  ;;  %2147 = vmatprep.mubr.bf16.mxu1 %v2727_v18 }
 0x12c   : > { %v352_v24 = vadd.f32 %v2122_v23, %v1901_v40  ;;  %v343_v25 = vpop.f32.mrb[15].mxu0  ;;  %2148 = vmatmul.mubr.bf16.gmra.mrb[8].mxu1 %v2725_v17  ;;  %v369_v27 = vmax.f32 %v349_v20, 0.0 }
 0x12d   : > { %v344_v26 = vadd.f32 %v1901_v40, %v343_v25  ;;  %v367_v29 = vmax.f32 %v341_v22, 0.0  ;;  %v2440_v40 = vld [vmem:[#allocation2 + $0xe8] sm:$0xff]   ;;  %2196 = vmatpush3.bf16.msra.mxu1 %v2439_v39 }
 0x12e   : > { %v370_v28 = vmax.f32 %v352_v24, 0.0  ;;  %2197 = vmatprep.subr.bf16.mxu1 %v2440_v40 }
 0x12f   : > { %v368_v30 = vmax.f32 %v344_v26, 0.0 }
 0x130   : > { %v2731_v31 = vpack.c.bf16 %v370_v28, %v369_v27 }
 0x131   : > { %v2733_v32 = vpack.c.bf16 %v368_v30, %v367_v29  ;;  %2198 = vmatpush3.bf16.msra.mxu1 %v2440_v40 }
 0x133   : > { %2151 = vmatprep.mubr.bf16.mxu1 %v2733_v32 }
 0x134   : > { %2152 = vmatmul.mubr.bf16.gmra.mrb[12].mxu1 %v2731_v31 }
 0x1ef   : > { %v2141_v42 = vpop.f32.mrb[0].mxu1 }
 0x1f0   : > { %v492_v43 = vadd.f32 %v2141_v42, %v1912_v41  ;;  %v483_v44 = vpop.f32.mrb[1].mxu1 }
 0x1f1   : > { %v484_v45 = vadd.f32 %v1912_v41, %v483_v44  ;;  %v2142_v46 = vpop.f32.mrb[2].mxu1  ;;  %v2442_v44 = vld [vmem:[#allocation2 + $0xf8] sm:$0xff]  }
 0x1f2   : > { %v495_v47 = vadd.f32 %v2142_v46, %v1912_v41  ;;  %v486_v48 = vpop.f32.mrb[3].mxu1  ;;  %v548_v50 = vmax.f32 %v492_v43, 0.0  ;;  %v2441_v43 = vld [vmem:[#allocation2 + $0xf0] sm:$0xff]  }
 0x1f3   : > { %v487_v49 = vadd.f32 %v1912_v41, %v486_v48  ;;  %v546_v52 = vmax.f32 %v484_v45, 0.0  ;;  %2199 = vmatprep.subr.bf16.mxu1 %v2441_v43  ;;  %v2443_v45 = vld [vmem:[#allocation2 + $0x100] sm:$0xff]   ;;  %v2445_v46 = vld [vmem:[#allocation2 + $0x110] sm:$0xff]  }
 0x1f4   : > { %v549_v51 = vmax.f32 %v495_v47, 0.0  ;;  %2200 = vmatpush3.bf16.msra.mxu1 %v2441_v43  ;;  %2219 = vmatprep.subr.bf16.mxu0 %v2443_v45  ;;  %v2446_v47 = vld [vmem:[#allocation2 + $0x118] sm:$0xff]   ;;  %v2447_v48 = vld [vmem:[#allocation2 + $0x120] sm:$0xff]  }
 0x1f5   : > { %v547_v55 = vmax.f32 %v487_v49, 0.0  ;;  %2201 = vmatprep.subr.bf16.mxu1 %v2442_v44  ;;  %v2448_v49 = vld [vmem:[#allocation2 + $0x128] sm:$0xff]  }
 0x1f6   : > { %v2740_v56 = vpack.c.bf16 %v549_v51, %v548_v50  ;;  %v1921_v50 = vld [vmem:[%s3007_s2 + $0x2] ss:$0 sm:$0xff] }
 0x1f7   : > { %v2742_v57 = vpack.c.bf16 %v547_v55, %v546_v52  ;;  %v2145_v58 = vpop.f32.mrb[4].mxu1 }
 0x1f8   : > { %v508_v59 = vadd.f32 %v2145_v58, %v1912_v41  ;;  %v499_v60 = vpop.f32.mrb[5].mxu1  ;;  %2202 = vmatpush3.bf16.msra.mxu1 %v2442_v44 }
 0x1f9   : > { %v500_v61 = vadd.f32 %v1912_v41, %v499_v60  ;;  %v2146_v62 = vpop.f32.mrb[6].mxu1  ;;  %2171 = vmatprep.mubr.bf16.mxu0 %v2742_v57 }
 0x1fa   : > { %v511_v63 = vadd.f32 %v2146_v62, %v1912_v41  ;;  %v502_v0 = vpop.f32.mrb[7].mxu1  ;;  %2172 = vmatmul.mubr.bf16.vlgmr.msra.gmra.mrb[16].mxu0 %v2740_v56  ;;  %v552_v2 = vmax.f32 %v508_v59, 0.0 }
 0x1fb   : > { %v503_v1 = vadd.f32 %v1912_v41, %v502_v0  ;;  %v550_v6 = vmax.f32 %v500_v61, 0.0  ;;  %2220 = vmatpush3.bf16.msra.mxu0 %v2443_v45 }
 0x1fc   : > { %v553_v5 = vmax.f32 %v511_v63, 0.0 }
 0x1fd   : > { %v551_v7 = vmax.f32 %v503_v1, 0.0 }
 0x1fe   : > { %v2746_v8 = vpack.c.bf16 %v553_v5, %v552_v2 }
 0x1ff   : > { %v2748_v9 = vpack.c.bf16 %v551_v7, %v550_v6  ;;  %v2149_v10 = vpop.f32.mrb[8].mxu1 }
 0x200   : > { %v524_v11 = vadd.f32 %v2149_v10, %v1912_v41  ;;  %v515_v12 = vpop.f32.mrb[9].mxu1 }
 0x201   : > { %v516_v13 = vadd.f32 %v1912_v41, %v515_v12  ;;  %v2150_v14 = vpop.f32.mrb[10].mxu1  ;;  %2175 = vmatprep.mubr.bf16.mxu0 %v2748_v9 }
 0x202   : > { %v527_v15 = vadd.f32 %v2150_v14, %v1912_v41  ;;  %v518_v16 = vpop.f32.mrb[11].mxu1  ;;  %2176 = vmatmul.mubr.bf16.gmra.mrb[20].mxu0 %v2746_v8  ;;  %v556_v20 = vmax.f32 %v524_v11, 0.0 }
 0x203   : > { %v519_v19 = vadd.f32 %v1912_v41, %v518_v16  ;;  %v554_v22 = vmax.f32 %v516_v13, 0.0 }
 0x204   : > { %v557_v21 = vmax.f32 %v527_v15, 0.0 }
 0x205   : > { %v555_v23 = vmax.f32 %v519_v19, 0.0 }
 0x206   : > { %v2752_v24 = vpack.c.bf16 %v557_v21, %v556_v20 }
 0x207   : > { %v2754_v25 = vpack.c.bf16 %v555_v23, %v554_v22  ;;  %v2153_v26 = vpop.f32.mrb[12].mxu1 }
 0x208   : > { %v540_v27 = vadd.f32 %v2153_v26, %v1912_v41  ;;  %v531_v28 = vpop.f32.mrb[13].mxu1 }
 0x209   : > { %v532_v29 = vadd.f32 %v1912_v41, %v531_v28  ;;  %v2154_v30 = vpop.f32.mrb[14].mxu1  ;;  %2179 = vmatprep.mubr.bf16.mxu0 %v2754_v25 }
 0x20a   : > { %v543_v33 = vadd.f32 %v2154_v30, %v1912_v41  ;;  %v534_v34 = vpop.f32.mrb[15].mxu1  ;;  %2180 = vmatmul.mubr.bf16.gmra.mrb[24].mxu0 %v2752_v24  ;;  %v560_v36 = vmax.f32 %v540_v27, 0.0 }
 0x20b   : > { %v535_v35 = vadd.f32 %v1912_v41, %v534_v34  ;;  %v558_v38 = vmax.f32 %v532_v29, 0.0  ;;  %v2444_v41 = vld [vmem:[#allocation2 + $0x108] sm:$0xff]  }
 0x20c   : > { %v561_v37 = vmax.f32 %v543_v33, 0.0  ;;  %2221 = vmatprep.subr.bf16.mxu0 %v2444_v41 }
 0x20d   : > { %v559_v39 = vmax.f32 %v535_v35, 0.0  ;;  %2222 = vmatpush3.bf16.msra.mxu0 %v2444_v41 }
 0x20e   : > { %v2758_v40 = vpack.c.bf16 %v561_v37, %v560_v36  ;;  %2223 = vmatprep.subr.bf16.mxu0 %v2445_v46 }
 0x20f   : > { %v2760_v42 = vpack.c.bf16 %v559_v39, %v558_v38 }
 0x211   : > { %2183 = vmatprep.mubr.bf16.mxu0 %v2760_v42  ;;  %2224 = vmatpush3.bf16.msra.mxu0 %v2445_v46 }
 0x212   : > { %2184 = vmatmul.mubr.bf16.gmra.mrb[28].mxu0 %v2758_v40  ;;  %2225 = vmatprep.subr.bf16.mxu0 %v2446_v47 }
 0x215   : > { %2226 = vmatpush3.bf16.msra.mxu0 %v2446_v47 }
 0x216   : > { %2227 = vmatprep.subr.bf16.mxu0 %v2447_v48 }
 0x219   : > { %2228 = vmatpush3.bf16.msra.mxu0 %v2447_v48 }
 0x21a   : > { %2229 = vmatprep.subr.bf16.mxu0 %v2448_v49 }
 0x21d   : > { %2230 = vmatpush3.bf16.msra.mxu0 %v2448_v49 }
 0x2cd   : > { %v2173_v51 = vpop.f32.mrb[16].mxu0 }
 0x2ce   : > { %v683_v52 = vadd.f32 %v2173_v51, %v1921_v50  ;;  %v674_v55 = vpop.f32.mrb[17].mxu0 }
 0x2cf   : > { %v675_v58 = vadd.f32 %v1921_v50, %v674_v55  ;;  %v2174_v59 = vpop.f32.mrb[18].mxu0 }
 0x2d0   : > { %v686_v60 = vadd.f32 %v2174_v59, %v1921_v50  ;;  %v677_v61 = vpop.f32.mrb[19].mxu0  ;;  %v739_v63 = vmax.f32 %v683_v52, 0.0 }
 0x2d1   : > { %v678_v62 = vadd.f32 %v1921_v50, %v677_v61  ;;  %v737_v1 = vmax.f32 %v675_v58, 0.0 }
 0x2d2   : > { %v740_v0 = vmax.f32 %v686_v60, 0.0 }
 0x2d3   : > { %v738_v2 = vmax.f32 %v678_v62, 0.0 }
 0x2d4   : > { %v2767_v5 = vpack.c.bf16 %v740_v0, %v739_v63  ;;  %v2449_v0 = vld [vmem:[#allocation2 + $0x130] sm:$0xff]  }
 0x2d5   : > { %v2769_v6 = vpack.c.bf16 %v738_v2, %v737_v1  ;;  %v2177_v7 = vpop.f32.mrb[20].mxu0  ;;  %2231 = vmatprep.subr.bf16.mxu0 %v2449_v0  ;;  %v2450_v1 = vld [vmem:[#allocation2 + $0x138] sm:$0xff]   ;;  %v2451_v2 = vld [vmem:[#allocation2 + $0x140] sm:$0xff]  }
 0x2d6   : > { %v699_v10 = vadd.f32 %v2177_v7, %v1921_v50  ;;  %v690_v11 = vpop.f32.mrb[21].mxu0  ;;  %2232 = vmatpush3.bf16.msra.mxu0 %v2449_v0  ;;  %2251 = vmatprep.subr.bf16.mxu1 %v2451_v2  ;;  %v2453_v7 = vld [vmem:[#allocation2 + $0x150] sm:$0xff]  }
 0x2d7   : > { %v691_v12 = vadd.f32 %v1921_v50, %v690_v11  ;;  %v2178_v13 = vpop.f32.mrb[22].mxu0  ;;  %2203 = vmatprep.mubr.bf16.mxu1 %v2769_v6  ;;  %2233 = vmatprep.subr.bf16.mxu0 %v2450_v1  ;;  %v2455_v11 = vld [vmem:[#allocation2 + $0x160] sm:$0xff]  }
 0x2d8   : > { %v702_v14 = vadd.f32 %v2178_v13, %v1921_v50  ;;  %v693_v15 = vpop.f32.mrb[23].mxu0  ;;  %2204 = vmatmul.mubr.bf16.vlgmr.msra.gmra.mrb[16].mxu1 %v2767_v5  ;;  %v743_v19 = vmax.f32 %v699_v10, 0.0  ;;  %v2454_v10 = vld [vmem:[#allocation2 + $0x158] sm:$0xff]  }
 0x2d9   : > { %v694_v16 = vadd.f32 %v1921_v50, %v693_v15  ;;  %v741_v21 = vmax.f32 %v691_v12, 0.0  ;;  %2252 = vmatpush3.bf16.msra.mxu1 %v2451_v2  ;;  %v1930_v12 = vld [vmem:[%s3007_s2 + $0x3] ss:$0 sm:$0xff] }
 0x2da   : > { %v744_v20 = vmax.f32 %v702_v14, 0.0  ;;  %2234 = vmatpush3.bf16.msra.mxu0 %v2450_v1 }
 0x2db   : > { %v742_v22 = vmax.f32 %v694_v16, 0.0 }
 0x2dc   : > { %v2773_v23 = vpack.c.bf16 %v744_v20, %v743_v19 }
 0x2dd   : > { %v2775_v26 = vpack.c.bf16 %v742_v22, %v741_v21  ;;  %v2181_v27 = vpop.f32.mrb[24].mxu0 }
 0x2de   : > { %v715_v28 = vadd.f32 %v2181_v27, %v1921_v50  ;;  %v706_v29 = vpop.f32.mrb[25].mxu0 }
 0x2df   : > { %v707_v30 = vadd.f32 %v1921_v50, %v706_v29  ;;  %v2182_v33 = vpop.f32.mrb[26].mxu0  ;;  %2207 = vmatprep.mubr.bf16.mxu1 %v2775_v26 }
 0x2e0   : > { %v718_v34 = vadd.f32 %v2182_v33, %v1921_v50  ;;  %v709_v35 = vpop.f32.mrb[27].mxu0  ;;  %2208 = vmatmul.mubr.bf16.gmra.mrb[20].mxu1 %v2773_v23  ;;  %v747_v37 = vmax.f32 %v715_v28, 0.0 }
 0x2e1   : > { %v710_v36 = vadd.f32 %v1921_v50, %v709_v35  ;;  %v745_v39 = vmax.f32 %v707_v30, 0.0 }
 0x2e2   : > { %v748_v38 = vmax.f32 %v718_v34, 0.0 }
 0x2e3   : > { %v746_v43 = vmax.f32 %v710_v36, 0.0 }
 0x2e4   : > { %v2779_v44 = vpack.c.bf16 %v748_v38, %v747_v37 }
 0x2e5   : > { %v2781_v45 = vpack.c.bf16 %v746_v43, %v745_v39  ;;  %v2185_v41 = vpop.f32.mrb[28].mxu0 }
 0x2e6   : > { %v731_v46 = vadd.f32 %v2185_v41, %v1921_v50  ;;  %v722_v47 = vpop.f32.mrb[29].mxu0 }
 0x2e7   : > { %v723_v48 = vadd.f32 %v1921_v50, %v722_v47  ;;  %v2186_v49 = vpop.f32.mrb[30].mxu0  ;;  %2211 = vmatprep.mubr.bf16.mxu1 %v2781_v45 }
 0x2e8   : > { %v734_v51 = vadd.f32 %v2186_v49, %v1921_v50  ;;  %v725_v52 = vpop.f32.mrb[31].mxu0  ;;  %2212 = vmatmul.mubr.bf16.gmra.mrb[24].mxu1 %v2779_v44  ;;  %v751_v58 = vmax.f32 %v731_v46, 0.0 }
 0x2e9   : > { %v726_v55 = vadd.f32 %v1921_v50, %v725_v52  ;;  %v749_v60 = vmax.f32 %v723_v48, 0.0  ;;  %v2452_v50 = vld [vmem:[#allocation2 + $0x148] sm:$0xff]  }
 0x2ea   : > { %v752_v59 = vmax.f32 %v734_v51, 0.0  ;;  %2253 = vmatprep.subr.bf16.mxu1 %v2452_v50 }
 0x2eb   : > { %v750_v61 = vmax.f32 %v726_v55, 0.0  ;;  %2254 = vmatpush3.bf16.msra.mxu1 %v2452_v50 }
 0x2ec   : > { %v2785_v62 = vpack.c.bf16 %v752_v59, %v751_v58  ;;  %2255 = vmatprep.subr.bf16.mxu1 %v2453_v7 }
 0x2ed   : > { %v2787_v63 = vpack.c.bf16 %v750_v61, %v749_v60 }
 0x2ef   : > { %2215 = vmatprep.mubr.bf16.mxu1 %v2787_v63  ;;  %2256 = vmatpush3.bf16.msra.mxu1 %v2453_v7 }
 0x2f0   : > { %2216 = vmatmul.mubr.bf16.gmra.mrb[28].mxu1 %v2785_v62  ;;  %2257 = vmatprep.subr.bf16.mxu1 %v2454_v10 }
 0x2f3   : > { %2258 = vmatpush3.bf16.msra.mxu1 %v2454_v10 }
 0x2f4   : > { %2259 = vmatprep.subr.bf16.mxu1 %v2455_v11 }
 0x2f7   : > { %2260 = vmatpush3.bf16.msra.mxu1 %v2455_v11 }
 0x3ab   : > { %v2205_v13 = vpop.f32.mrb[16].mxu1 }
 0x3ac   : > { %v874_v14 = vadd.f32 %v2205_v13, %v1930_v12  ;;  %v865_v15 = vpop.f32.mrb[17].mxu1 }
 0x3ad   : > { %v866_v16 = vadd.f32 %v1930_v12, %v865_v15  ;;  %v2206_v19 = vpop.f32.mrb[18].mxu1 }
 0x3ae   : > { %v877_v20 = vadd.f32 %v2206_v19, %v1930_v12  ;;  %v868_v21 = vpop.f32.mrb[19].mxu1  ;;  %v930_v27 = vmax.f32 %v874_v14, 0.0 }
 0x3af   : > { %v869_v22 = vadd.f32 %v1930_v12, %v868_v21  ;;  %v928_v29 = vmax.f32 %v866_v16, 0.0 }
 0x3b0   : > { %v931_v28 = vmax.f32 %v877_v20, 0.0 }
 0x3b1   : > { %v929_v30 = vmax.f32 %v869_v22, 0.0 }
 0x3b2   : > { %v945_v33 = vpack.c.bf16 %v931_v28, %v930_v27 }
 0x3b3   : > { %v944_v34 = vpack.c.bf16 %v929_v30, %v928_v29  ;;  %v2209_v35 = vpop.f32.mrb[20].mxu1 }
 0x3b4   : > { %v890_v36 = vadd.f32 %v2209_v35, %v1930_v12  ;;  %v881_v37 = vpop.f32.mrb[21].mxu1 }
 0x3b5   : > { %v882_v38 = vadd.f32 %v1930_v12, %v881_v37  ;;  %v2210_v39 = vpop.f32.mrb[22].mxu1  ;;  %2235 = vmatprep.mubr.bf16.mxu0 %v944_v34 }
 0x3b6   : > { %v893_v43 = vadd.f32 %v2210_v39, %v1930_v12  ;;  %v884_v41 = vpop.f32.mrb[23].mxu1  ;;  %2236 = vmatmul.mubr.bf16.vlgmr.msra.gmra.mrb[32].mxu0 %v945_v33  ;;  %v934_v47 = vmax.f32 %v890_v36, 0.0  ;;  %v2457_v39 = vld [vmem:[#allocation2 + $0x170] sm:$0xff]  }
 0x3b7   : > { %v885_v46 = vadd.f32 %v1930_v12, %v884_v41  ;;  %v932_v49 = vmax.f32 %v882_v38, 0.0  ;;  %v2456_v38 = vld [vmem:[#allocation2 + $0x168] sm:$0xff]   ;;  %v2459_v41 = vld [vmem:[#allocation2 + $0x180] sm:$0xff]  }
 0x3b8   : > { %v935_v48 = vmax.f32 %v893_v43, 0.0  ;;  %2261 = vmatprep.subr.bf16.mxu1 %v2456_v38  ;;  %v2458_v43 = vld [vmem:[#allocation2 + $0x178] sm:$0xff]   ;;  %2283 = vmatprep.subr.bf16.mxu0 %v2459_v41 }
 0x3b9   : > { %v933_v51 = vmax.f32 %v885_v46, 0.0  ;;  %2262 = vmatpush3.bf16.msra.mxu1 %v2456_v38  ;;  %v2460_v46 = vld [vmem:[#allocation2 + $0x188] sm:$0xff]   ;;  %2284 = vmatpush3.bf16.msra.mxu0 %v2459_v41  ;;  %v1142_v41 = vunpack.c.h.bf16 %v2773_v23 }
 0x3ba   : > { %v947_v52 = vpack.c.bf16 %v935_v48, %v934_v47  ;;  %2263 = vmatprep.subr.bf16.mxu1 %v2457_v39  ;;  %2285 = vmatprep.subr.bf16.mxu0 %v2460_v46  ;;  %v2462_v47 = vld [vmem:[#allocation2 + $0x198] sm:$0xff]   ;;  %v2463_v48 = vld [vmem:[#allocation2 + $0x1a0] sm:$0xff]  }
 0x3bb   : > { %v946_v55 = vpack.c.bf16 %v933_v51, %v932_v49  ;;  %v2213_v58 = vpop.f32.mrb[24].mxu1  ;;  %v2797_v49 = vld [vmem:[%s3007_s2 + $0x4] ss:$0 sm:$0xff] }
 0x3bc   : > { %v906_v59 = vadd.f32 %v2213_v58, %v1930_v12  ;;  %v897_v60 = vpop.f32.mrb[25].mxu1 }
 0x3bd   : > { %v898_v61 = vadd.f32 %v1930_v12, %v897_v60  ;;  %v2214_v0 = vpop.f32.mrb[26].mxu1  ;;  %2239 = vmatprep.mubr.bf16.mxu0 %v946_v55  ;;  %2264 = vmatpush3.bf16.msra.mxu1 %v2457_v39 }
 0x3be   : > { %v909_v1 = vadd.f32 %v2214_v0, %v1930_v12  ;;  %v900_v2 = vpop.f32.mrb[27].mxu1  ;;  %2240 = vmatmul.mubr.bf16.gmra.mrb[36].mxu0 %v947_v52  ;;  %v938_v7 = vmax.f32 %v906_v59, 0.0  ;;  %2265 = vmatprep.subr.bf16.mxu1 %v2458_v43 }
 0x3bf   : > { %v901_v50 = vadd.f32 %v1930_v12, %v900_v2  ;;  %v936_v11 = vmax.f32 %v898_v61, 0.0  ;;  %2286 = vmatpush3.bf16.msra.mxu0 %v2460_v46  ;;  %v1137_v61 = vunpack.c.l.bf16 %v2767_v5 }
 0x3c0   : > { %v939_v10 = vmax.f32 %v909_v1, 0.0 }
 0x3c1   : > { %v937_v13 = vmax.f32 %v901_v50, 0.0  ;;  %2266 = vmatpush3.bf16.msra.mxu1 %v2458_v43  ;;  %v1135_v50 = vunpack.c.l.bf16 %v2769_v6 }
 0x3c2   : > { %v949_v14 = vpack.c.bf16 %v939_v10, %v938_v7 }
 0x3c3   : > { %v948_v15 = vpack.c.bf16 %v937_v13, %v936_v11  ;;  %v2217_v16 = vpop.f32.mrb[28].mxu1  ;;  %v1138_v13 = vunpack.c.h.bf16 %v2767_v5 }
 0x3c4   : > { %v922_v19 = vadd.f32 %v2217_v16, %v1930_v12  ;;  %v913_v20 = vpop.f32.mrb[29].mxu1  ;;  %v1136_v16 = vunpack.c.h.bf16 %v2769_v6  ;;  %v1139_v6 = vunpack.c.l.bf16 %v2775_v26 }
 0x3c5   : > { %v914_v21 = vadd.f32 %v1930_v12, %v913_v20  ;;  %v2218_v22 = vpop.f32.mrb[30].mxu1  ;;  %2243 = vmatprep.mubr.bf16.mxu0 %v948_v15 }
 0x3c6   : > { %v925_v27 = vadd.f32 %v2218_v22, %v1930_v12  ;;  %v916_v28 = vpop.f32.mrb[31].mxu1  ;;  %2244 = vmatmul.mubr.bf16.gmra.mrb[40].mxu0 %v949_v14  ;;  %v942_v30 = vmax.f32 %v922_v19, 0.0 }
 0x3c7   : > { %v917_v29 = vadd.f32 %v1930_v12, %v916_v28  ;;  %v940_v34 = vmax.f32 %v914_v21, 0.0  ;;  %v2461_v12 = vld [vmem:[#allocation2 + $0x190] sm:$0xff]  }
 0x3c8   : > { %v943_v33 = vmax.f32 %v925_v27, 0.0  ;;  %2287 = vmatprep.subr.bf16.mxu0 %v2461_v12 }
 0x3c9   : > { %v941_v35 = vmax.f32 %v917_v29, 0.0  ;;  %2288 = vmatpush3.bf16.msra.mxu0 %v2461_v12 }
 0x3ca   : > { %v951_v36 = vpack.c.bf16 %v943_v33, %v942_v30  ;;  %2289 = vmatprep.subr.bf16.mxu0 %v2462_v47 }
 0x3cb   : > { %v950_v37 = vpack.c.bf16 %v941_v35, %v940_v34  ;;  %v1141_v35 = vunpack.c.l.bf16 %v2773_v23 }
 0x3cd   : > { %2247 = vmatprep.mubr.bf16.mxu0 %v950_v37  ;;  %2290 = vmatpush3.bf16.msra.mxu0 %v2462_v47  ;;  %v1140_v47 = vunpack.c.h.bf16 %v2775_v26  ;;  %v1143_v26 = vunpack.c.l.bf16 %v2781_v45 }
 0x3ce   : > { %2248 = vmatmul.mubr.bf16.gmra.mrb[44].mxu0 %v951_v36  ;;  %2291 = vmatprep.subr.bf16.mxu0 %v2463_v48 }
 0x3d1   : > { %2292 = vmatpush3.bf16.msra.mxu0 %v2463_v48 }
 0x489   : > { %v2237_v51 = vpop.f32.mrb[32].mxu0 }
 0x48a   : > { %v1065_v52 = vadd.f32 %v2237_v51, %v2797_v49  ;;  %v1056_v55 = vpop.f32.mrb[33].mxu0 }
 0x48b   : > { %v1057_v58 = vadd.f32 %v2797_v49, %v1056_v55  ;;  %v2238_v59 = vpop.f32.mrb[34].mxu0 }
 0x48c   : > { %v1121_v60 = vmax.f32 %v1065_v52, 0.0  ;;  %v1068_v0 = vadd.f32 %v2238_v59, %v2797_v49  ;;  %v1059_v1 = vpop.f32.mrb[35].mxu0 }
 0x48d   : > { %v1119_v2 = vmax.f32 %v1057_v58, 0.0  ;;  %v1060_v7 = vadd.f32 %v2797_v49, %v1059_v1 }
 0x48e   : > { %v1153_v10 = vadd.f32 %v1137_v61, %v1121_v60  ;;  %v1122_v11 = vmax.f32 %v1068_v0, 0.0 }
 0x48f   : > { %v1151_v14 = vadd.f32 %v1135_v50, %v1119_v2  ;;  %v1120_v15 = vmax.f32 %v1060_v7, 0.0  ;;  %v1145_v2 = vunpack.c.l.bf16 %v2779_v44 }
 0x490   : > { %v1154_v19 = vadd.f32 %v1138_v13, %v1122_v11 }
 0x491   : > { %v1152_v20 = vadd.f32 %v1136_v16, %v1120_v15  ;;  %v2241_v21 = vpop.f32.mrb[36].mxu0 }
 0x492   : > { %v1168_v22 = vpack.c.bf16 %v1154_v19, %v1153_v10  ;;  %v1081_v27 = vadd.f32 %v2241_v21, %v2797_v49  ;;  %v1072_v28 = vpop.f32.mrb[37].mxu0  ;;  %v1144_v19 = vunpack.c.h.bf16 %v2781_v45  ;;  %v1147_v45 = vunpack.c.l.bf16 %v2787_v63 }
 0x493   : > { %v1073_v29 = vadd.f32 %v2797_v49, %v1072_v28  ;;  %v2242_v30 = vpop.f32.mrb[38].mxu0  ;;  %v1167_v33 = vpack.c.bf16 %v1152_v20, %v1151_v14  ;;  %v1146_v14 = vunpack.c.h.bf16 %v2779_v44 }
 0x494   : > { %v1125_v34 = vmax.f32 %v1081_v27, 0.0  ;;  %v1084_v5 = vadd.f32 %v2242_v30, %v2797_v49  ;;  %v1075_v36 = vpop.f32.mrb[39].mxu0 }
 0x495   : > { %v1123_v37 = vmax.f32 %v1073_v29, 0.0  ;;  %v1076_v38 = vadd.f32 %v2797_v49, %v1075_v36  ;;  %2267 = vmatprep.mubr.bf16.mxu1 %v1167_v33 }
 0x496   : > { %v1157_v39 = vadd.f32 %v1141_v35, %v1125_v34  ;;  %v1126_v43 = vmax.f32 %v1084_v5, 0.0  ;;  %2268 = vmatmul.mubr.bf16.vlgmr.msra.gmra.mrb[32].mxu1 %v1168_v22  ;;  %v1149_v5 = vunpack.c.l.bf16 %v2785_v62 }
 0x497   : > { %v1155_v46 = vadd.f32 %v1139_v6, %v1123_v37  ;;  %v1124_v12 = vmax.f32 %v1076_v38, 0.0 }
 0x498   : > { %v1158_v48 = vadd.f32 %v1142_v41, %v1126_v43  ;;  %v1150_v43 = vunpack.c.h.bf16 %v2785_v62  ;;  %v2467_v62 = vld [vmem:[#allocation2 + $0x1c0] sm:$0xff]  }
 0x499   : > { %v1156_v51 = vadd.f32 %v1140_v47, %v1124_v12  ;;  %v2245_v52 = vpop.f32.mrb[40].mxu0  ;;  %v1148_v12 = vunpack.c.h.bf16 %v2787_v63  ;;  %2347 = vmatprep.subr.bf16.mxu1 %v2467_v62  ;;  %v2834_v63 = vld [vmem:[#allocation2 + $0x1d0] sm:$0xff]  }
 0x49a   : > { %v1097_v55 = vadd.f32 %v2245_v52, %v2797_v49  ;;  %v1088_v58 = vpop.f32.mrb[41].mxu0  ;;  %v1170_v59 = vpack.c.bf16 %v1158_v48, %v1157_v39  ;;  %2355 = vmatpush3.bf16.msra.mxu1 %v2467_v62 }
 0x49b   : > { %v1089_v60 = vadd.f32 %v2797_v49, %v1088_v58  ;;  %v2246_v61 = vpop.f32.mrb[42].mxu0  ;;  %v1169_v0 = vpack.c.bf16 %v1156_v51, %v1155_v46  ;;  %v2466_v58 = vld [vmem:[#allocation2 + $0x1b8] sm:$0xff]  }
 0x49c   : > { %v1129_v1 = vmax.f32 %v1097_v55, 0.0  ;;  %v1100_v23 = vadd.f32 %v2246_v61, %v2797_v49  ;;  %v1091_v50 = vpop.f32.mrb[43].mxu0  ;;  %v2464_v55 = vld [vmem:[#allocation2 + $0x1a8] sm:$0xff]   ;;  %v2842_v61 = vld [vmem:[#allocation2 + $0x1e0] sm:$0xff]  }
 0x49d   : > { %v1127_v7 = vmax.f32 %v1089_v60, 0.0  ;;  %v1092_v10 = vadd.f32 %v2797_v49, %v1091_v50  ;;  %2271 = vmatprep.mubr.bf16.mxu1 %v1169_v0  ;;  %2293 = vmatprep.subr.bf16.mxu0 %v2464_v55  ;;  %v2838_v60 = vld [vmem:[#allocation2 + $0x1d8] sm:$0xff]   ;;  %v2850_v0 = vld [vmem:[%s3007_s2 + $0x5] ss:$0 sm:$0xff] }
 0x49e   : > { %v1161_v11 = vadd.f32 %v1145_v2, %v1129_v1  ;;  %v1130_v13 = vmax.f32 %v1100_v23, 0.0  ;;  %2272 = vmatmul.mubr.bf16.gmra.mrb[36].mxu1 %v1170_v59  ;;  %2294 = vmatpush3.bf16.msra.mxu0 %v2464_v55  ;;  %v2831_v59 = vld [vmem:[#allocation2 + $0x1c8] sm:$0xff]  }
 0x49f   : > { %v1159_v15 = vadd.f32 %v1143_v26, %v1127_v7  ;;  %v1128_v16 = vmax.f32 %v1092_v10, 0.0  ;;  %2348 = vmatprep.subr.bf16.mxu1 %v2831_v59  ;;  %v1360_v10 = vunpack.c.l.bf16 %v2740_v56 }
 0x4a0   : > { %v1162_v20 = vadd.f32 %v1146_v14, %v1130_v13  ;;  %2356 = vmatpush3.bf16.msra.mxu1 %v2831_v59 }
 0x4a1   : > { %v1160_v21 = vadd.f32 %v1144_v19, %v1128_v16  ;;  %v2249_v22 = vpop.f32.mrb[44].mxu0  ;;  %2349 = vmatprep.subr.bf16.mxu1 %v2834_v63 }
 0x4a2   : > { %v1113_v27 = vadd.f32 %v2249_v22, %v2797_v49  ;;  %v1104_v28 = vpop.f32.mrb[45].mxu0  ;;  %v1172_v29 = vpack.c.bf16 %v1162_v20, %v1161_v11 }
 0x4a3   : > { %v1105_v30 = vadd.f32 %v2797_v49, %v1104_v28  ;;  %v2250_v33 = vpop.f32.mrb[46].mxu0  ;;  %v1171_v34 = vpack.c.bf16 %v1160_v21, %v1159_v15  ;;  %v1358_v15 = vunpack.c.l.bf16 %v2742_v57  ;;  %v1361_v21 = vunpack.c.h.bf16 %v2740_v56 }
 0x4a4   : > { %v1133_v35 = vmax.f32 %v1113_v27, 0.0  ;;  %v1116_v44 = vadd.f32 %v2250_v33, %v2797_v49  ;;  %v1107_v36 = vpop.f32.mrb[47].mxu0  ;;  %2357 = vmatpush3.bf16.msra.mxu1 %v2834_v63  ;;  %v1359_v28 = vunpack.c.h.bf16 %v2742_v57  ;;  %v1362_v57 = vunpack.c.l.bf16 %v2748_v9 }
 0x4a5   : > { %v1131_v37 = vmax.f32 %v1105_v30, 0.0  ;;  %v1108_v6 = vadd.f32 %v2797_v49, %v1107_v36  ;;  %2275 = vmatprep.mubr.bf16.mxu1 %v1171_v34  ;;  %v2465_v49 = vld [vmem:[#allocation2 + $0x1b0] sm:$0xff]   ;;  %2350 = vmatprep.subr.bf16.mxu1 %v2838_v60 }
 0x4a6   : > { %v1165_v38 = vadd.f32 %v1149_v5, %v1133_v35  ;;  %v1134_v39 = vmax.f32 %v1116_v44, 0.0  ;;  %2276 = vmatmul.mubr.bf16.gmra.mrb[40].mxu1 %v1172_v29  ;;  %2295 = vmatprep.subr.bf16.mxu0 %v2465_v49 }
 0x4a7   : > { %v1163_v41 = vadd.f32 %v1147_v45, %v1131_v37  ;;  %v1132_v46 = vmax.f32 %v1108_v6, 0.0  ;;  %2296 = vmatpush3.bf16.msra.mxu0 %v2465_v49  ;;  %v1364_v6 = vunpack.c.l.bf16 %v2746_v8 }
 0x4a8   : > { %v1166_v47 = vadd.f32 %v1150_v43, %v1134_v39  ;;  %2297 = vmatprep.subr.bf16.mxu0 %v2466_v58  ;;  %2358 = vmatpush3.bf16.msra.mxu1 %v2838_v60 }
 0x4a9   : > { %v1164_v48 = vadd.f32 %v1148_v12, %v1132_v46  ;;  %2351 = vmatprep.subr.bf16.mxu1 %v2842_v61  ;;  %v1365_v12 = vunpack.c.h.bf16 %v2746_v8 }
 0x4aa   : > { %v1174_v51 = vpack.c.bf16 %v1166_v47, %v1165_v38 }
 0x4ab   : > { %v1173_v52 = vpack.c.bf16 %v1164_v48, %v1163_v41  ;;  %2298 = vmatpush3.bf16.msra.mxu0 %v2466_v58 }
 0x4ac   : > { %2315 = vmatprep.subr.bf16.mxu0 %v2467_v62  ;;  %2359 = vmatpush3.bf16.msra.mxu1 %v2842_v61 }
 0x4ad   : > { %2279 = vmatprep.mubr.bf16.mxu1 %v1173_v52 }
 0x4ae   : > { %2280 = vmatmul.mubr.bf16.gmra.mrb[44].mxu1 %v1174_v51  ;;  %v1363_v51 = vunpack.c.h.bf16 %v2748_v9 }
 0x569   : > { %v2269_v1 = vpop.f32.mrb[32].mxu1 }
 0x56a   : > { %v1288_v2 = vadd.f32 %v2269_v1, %v2850_v0  ;;  %v1279_v23 = vpop.f32.mrb[33].mxu1 }
 0x56b   : > { %v1280_v50 = vadd.f32 %v2850_v0, %v1279_v23  ;;  %v2270_v7 = vpop.f32.mrb[34].mxu1 }
 0x56c   : > { %v1344_v26 = vmax.f32 %v1288_v2, 0.0  ;;  %v1291_v11 = vadd.f32 %v2270_v7, %v2850_v0  ;;  %v1282_v13 = vpop.f32.mrb[35].mxu1 }
 0x56d   : > { %v1342_v14 = vmax.f32 %v1280_v50, 0.0  ;;  %v1283_v16 = vadd.f32 %v2850_v0, %v1282_v13 }
 0x56e   : > { %v1376_v19 = vadd.f32 %v1360_v10, %v1344_v26  ;;  %v1345_v20 = vmax.f32 %v1291_v11, 0.0  ;;  %v1368_v26 = vunpack.c.l.bf16 %v2752_v24  ;;  %v1366_v11 = vunpack.c.l.bf16 %v2754_v25 }
 0x56f   : > { %v1374_v22 = vadd.f32 %v1358_v15, %v1342_v14  ;;  %v1343_v27 = vmax.f32 %v1283_v16, 0.0  ;;  %v1369_v16 = vunpack.c.h.bf16 %v2752_v24 }
 0x570   : > { %v1377_v29 = vadd.f32 %v1361_v21, %v1345_v20  ;;  %v1367_v20 = vunpack.c.h.bf16 %v2754_v25  ;;  %v1372_v25 = vunpack.c.l.bf16 %v2758_v40 }
 0x571   : > { %v1375_v30 = vadd.f32 %v1359_v28, %v1343_v27  ;;  %v2273_v33 = vpop.f32.mrb[36].mxu1 }
 0x572   : > { %v1391_v34 = vpack.c.bf16 %v1377_v29, %v1376_v19  ;;  %v1304_v35 = vadd.f32 %v2273_v33, %v2850_v0  ;;  %v1295_v5 = vpop.f32.mrb[37].mxu1 }
 0x573   : > { %v1296_v44 = vadd.f32 %v2850_v0, %v1295_v5  ;;  %v2274_v36 = vpop.f32.mrb[38].mxu1  ;;  %v1390_v37 = vpack.c.bf16 %v1375_v30, %v1374_v22 }
 0x574   : > { %v1348_v45 = vmax.f32 %v1304_v35, 0.0  ;;  %v1307_v56 = vadd.f32 %v2274_v36, %v2850_v0  ;;  %v1298_v38 = vpop.f32.mrb[39].mxu1  ;;  %v1370_v36 = vunpack.c.l.bf16 %v2760_v42 }
 0x575   : > { %v1346_v39 = vmax.f32 %v1296_v44, 0.0  ;;  %v1299_v43 = vadd.f32 %v2850_v0, %v1298_v38  ;;  %2299 = vmatprep.mubr.bf16.mxu0 %v1390_v37 }
 0x576   : > { %v1380_v41 = vadd.f32 %v1364_v6, %v1348_v45  ;;  %v1349_v46 = vmax.f32 %v1307_v56, 0.0  ;;  %2300 = vmatmul.mubr.bf16.vlgmr.msra.gmra.mrb[48].mxu0 %v1391_v34  ;;  %v1373_v56 = vunpack.c.h.bf16 %v2758_v40  ;;  %v2474_v40 = vld [vmem:[#allocation2 + $0x1f8] sm:$0xff]  }
 0x577   : > { %v1378_v47 = vadd.f32 %v1362_v57, %v1346_v39  ;;  %v1347_v48 = vmax.f32 %v1299_v43, 0.0  ;;  %2316 = vmatpush3.bf16.msra.mxu0 %v2467_v62  ;;  %v1371_v39 = vunpack.c.h.bf16 %v2760_v42  ;;  %v2895_v42 = vld [vmem:[%s3007_s2 + $0x6] ss:$0 sm:$0xff] }
 0x578   : > { %v1381_v52 = vadd.f32 %v1365_v12, %v1349_v46  ;;  %2317 = vmatprep.subr.bf16.mxu0 %v2831_v59  ;;  %v2472_v12 = vld [vmem:[#allocation2 + $0x1e8] sm:$0xff]  }
 0x579   : > { %v1379_v55 = vadd.f32 %v1363_v51, %v1347_v48  ;;  %v2277_v49 = vpop.f32.mrb[40].mxu1  ;;  %2352 = vmatprep.subr.bf16.mxu1 %v2472_v12 }
 0x57a   : > { %v1320_v58 = vadd.f32 %v2277_v49, %v2850_v0  ;;  %v1311_v1 = vpop.f32.mrb[41].mxu1  ;;  %v1393_v2 = vpack.c.bf16 %v1381_v52, %v1380_v41  ;;  %2360 = vmatpush3.bf16.msra.mxu1 %v2472_v12  ;;  %v1583_v49 = vunpack.c.l.bf16 %v2713_v53 }
 0x57b   : > { %v1312_v23 = vadd.f32 %v2850_v0, %v1311_v1  ;;  %v2278_v50 = vpop.f32.mrb[42].mxu1  ;;  %v1392_v7 = vpack.c.bf16 %v1379_v55, %v1378_v47  ;;  %2318 = vmatpush3.bf16.msra.mxu0 %v2831_v59 }
 0x57c   : > { %v1352_v8 = vmax.f32 %v1320_v58, 0.0  ;;  %v1323_v9 = vadd.f32 %v2278_v50, %v2850_v0  ;;  %v1314_v62 = vpop.f32.mrb[43].mxu1  ;;  %2319 = vmatprep.subr.bf16.mxu0 %v2834_v63 }
 0x57d   : > { %v1350_v10 = vmax.f32 %v1312_v23, 0.0  ;;  %v1315_v13 = vadd.f32 %v2850_v0, %v1314_v62  ;;  %2303 = vmatprep.mubr.bf16.mxu0 %v1392_v7  ;;  %v1581_v23 = vunpack.c.l.bf16 %v2715_v54 }
 0x57e   : > { %v1384_v14 = vadd.f32 %v1368_v26, %v1352_v8  ;;  %v1353_v15 = vmax.f32 %v1323_v9, 0.0  ;;  %2304 = vmatmul.mubr.bf16.gmra.mrb[52].mxu0 %v1393_v2  ;;  %v1584_v26 = vunpack.c.h.bf16 %v2713_v53 }
 0x57f   : > { %v1382_v59 = vadd.f32 %v1366_v11, %v1350_v10  ;;  %v1351_v19 = vmax.f32 %v1315_v13, 0.0  ;;  %2320 = vmatpush3.bf16.msra.mxu0 %v2834_v63  ;;  %v1582_v10 = vunpack.c.h.bf16 %v2715_v54  ;;  %v1585_v54 = vunpack.c.l.bf16 %v2721_v4 }
 0x580   : > { %v1385_v21 = vadd.f32 %v1369_v16, %v1353_v15  ;;  %2321 = vmatprep.subr.bf16.mxu0 %v2838_v60 }
 0x581   : > { %v1383_v22 = vadd.f32 %v1367_v20, %v1351_v19  ;;  %v2281_v27 = vpop.f32.mrb[44].mxu1 }
 0x582   : > { %v1336_v28 = vadd.f32 %v2281_v27, %v2850_v0  ;;  %v1327_v29 = vpop.f32.mrb[45].mxu1  ;;  %v1395_v30 = vpack.c.bf16 %v1385_v21, %v1384_v14  ;;  %v1587_v27 = vunpack.c.l.bf16 %v2719_v3 }
 0x583   : > { %v1328_v33 = vadd.f32 %v2850_v0, %v1327_v29  ;;  %v2282_v34 = vpop.f32.mrb[46].mxu1  ;;  %v1394_v24 = vpack.c.bf16 %v1383_v22, %v1382_v59  ;;  %2322 = vmatpush3.bf16.msra.mxu0 %v2838_v60 }
 0x584   : > { %v1356_v35 = vmax.f32 %v1336_v28, 0.0  ;;  %v1339_v63 = vadd.f32 %v2282_v34, %v2850_v0  ;;  %v1330_v5 = vpop.f32.mrb[47].mxu1  ;;  %2323 = vmatprep.subr.bf16.mxu0 %v2842_v61 }
 0x585   : > { %v1354_v44 = vmax.f32 %v1328_v33, 0.0  ;;  %v1331_v37 = vadd.f32 %v2850_v0, %v1330_v5  ;;  %2307 = vmatprep.mubr.bf16.mxu0 %v1394_v24  ;;  %v2473_v0 = vld [vmem:[#allocation2 + $0x1f0] sm:$0xff]   ;;  %v1588_v24 = vunpack.c.h.bf16 %v2719_v3 }
 0x586   : > { %v1388_v45 = vadd.f32 %v1372_v25, %v1356_v35  ;;  %v1357_v6 = vmax.f32 %v1339_v63, 0.0  ;;  %2308 = vmatmul.mubr.bf16.gmra.mrb[56].mxu0 %v1395_v30  ;;  %2353 = vmatprep.subr.bf16.mxu1 %v2473_v0  ;;  %v1586_v63 = vunpack.c.h.bf16 %v2721_v4  ;;  %v1589_v4 = vunpack.c.l.bf16 %v2727_v18 }
 0x587   : > { %v1386_v60 = vadd.f32 %v1370_v36, %v1354_v44  ;;  %v1355_v38 = vmax.f32 %v1331_v37, 0.0  ;;  %2324 = vmatpush3.bf16.msra.mxu0 %v2842_v61  ;;  %2361 = vmatpush3.bf16.msra.mxu1 %v2473_v0 }
 0x588   : > { %v1389_v57 = vadd.f32 %v1373_v56, %v1357_v6  ;;  %2325 = vmatprep.subr.bf16.mxu0 %v2472_v12  ;;  %2354 = vmatprep.subr.bf16.mxu1 %v2474_v40 }
 0x589   : > { %v1387_v43 = vadd.f32 %v1371_v39, %v1355_v38 }
 0x58a   : > { %v1397_v41 = vpack.c.bf16 %v1389_v57, %v1388_v45  ;;  %v1591_v57 = vunpack.c.l.bf16 %v2725_v17 }
 0x58b   : > { %v1396_v46 = vpack.c.bf16 %v1387_v43, %v1386_v60  ;;  %2326 = vmatpush3.bf16.msra.mxu0 %v2472_v12  ;;  %2362 = vmatpush3.bf16.msra.mxu1 %v2474_v40 }
 0x58c   : > { %2327 = vmatprep.subr.bf16.mxu0 %v2473_v0 }
 0x58d   : > { %2311 = vmatprep.mubr.bf16.mxu0 %v1396_v46 }
 0x58e   : > { %2312 = vmatmul.mubr.bf16.gmra.mrb[60].mxu0 %v1397_v41 }
 0x58f   : > { %2328 = vmatpush3.bf16.msra.mxu0 %v2473_v0 }
 0x590   : > { %2329 = vmatprep.subr.bf16.mxu0 %v2474_v40 }
 0x593   : > { %2330 = vmatpush3.bf16.msra.mxu0 %v2474_v40  ;;  %v1592_v40 = vunpack.c.h.bf16 %v2725_v17 }
 0x649   : > { %v2301_v61 = vpop.f32.mrb[48].mxu0 }
 0x64a   : > { %v1511_v47 = vadd.f32 %v2301_v61, %v2895_v42  ;;  %v1502_v48 = vpop.f32.mrb[49].mxu0 }
 0x64b   : > { %v1503_v51 = vadd.f32 %v2895_v42, %v1502_v48  ;;  %v2302_v52 = vpop.f32.mrb[50].mxu0  ;;  %v1590_v48 = vunpack.c.h.bf16 %v2727_v18  ;;  %v1593_v18 = vunpack.c.l.bf16 %v2733_v32 }
 0x64c   : > { %v1567_v55 = vmax.f32 %v1511_v47, 0.0  ;;  %v1514_v58 = vadd.f32 %v2302_v52, %v2895_v42  ;;  %v1505_v1 = vpop.f32.mrb[51].mxu0 }
 0x64d   : > { %v1565_v2 = vmax.f32 %v1503_v51, 0.0  ;;  %v1506_v50 = vadd.f32 %v2895_v42, %v1505_v1 }
 0x64e   : > { %v1599_v7 = vadd.f32 %v1583_v49, %v1567_v55  ;;  %v1568_v8 = vmax.f32 %v1514_v58, 0.0 }
 0x64f   : > { %v1597_v9 = vadd.f32 %v1581_v23, %v1565_v2  ;;  %v1566_v62 = vmax.f32 %v1506_v50, 0.0 }
 0x650   : > { %v1600_v11 = vadd.f32 %v1584_v26, %v1568_v8  ;;  %v1595_v8 = vunpack.c.l.bf16 %v2731_v31 }
 0x651   : > { %v1598_v13 = vadd.f32 %v1582_v10, %v1566_v62  ;;  %v2305_v14 = vpop.f32.mrb[52].mxu0 }
 0x652   : > { %v1614_v15 = vpack.c.bf16 %v1600_v11, %v1599_v7  ;;  %v1527_v16 = vadd.f32 %v2305_v14, %v2895_v42  ;;  %v1518_v59 = vpop.f32.mrb[53].mxu0 }
 0x653   : > { %v1519_v19 = vadd.f32 %v2895_v42, %v1518_v59  ;;  %v2306_v20 = vpop.f32.mrb[54].mxu0  ;;  %v1613_v21 = vpack.c.bf16 %v1598_v13, %v1597_v9  ;;  %v1596_v13 = vunpack.c.h.bf16 %v2731_v31 }
 0x654   : > { %v1571_v22 = vmax.f32 %v1527_v16, 0.0  ;;  %v1530_v53 = vadd.f32 %v2306_v20, %v2895_v42  ;;  %v1521_v28 = vpop.f32.mrb[55].mxu0  ;;  %v1594_v16 = vunpack.c.h.bf16 %v2733_v32 }
 0x655   : > { %v1569_v29 = vmax.f32 %v1519_v19, 0.0  ;;  %v1522_v30 = vadd.f32 %v2895_v42, %v1521_v28  ;;  %2331 = vmatprep.mubr.bf16.mxu0 %v1613_v21 }
 0x656   : > { %v1603_v33 = vadd.f32 %v1587_v27, %v1571_v22  ;;  %v1572_v34 = vmax.f32 %v1530_v53, 0.0  ;;  %2332 = vmatmul.mubr.bf16.vlgmr.msra.gmra.mrb[64].mxu0 %v1614_v15 }
 0x657   : > { %v1601_v35 = vadd.f32 %v1585_v54, %v1569_v29  ;;  %v1570_v25 = vmax.f32 %v1522_v30, 0.0 }
 0x658   : > { %v1604_v5 = vadd.f32 %v1588_v24, %v1572_v34 }
 0x659   : > { %v1602_v44 = vadd.f32 %v1586_v63, %v1570_v25  ;;  %v2309_v36 = vpop.f32.mrb[56].mxu0 }
 0x65a   : > { %v1616_v37 = vpack.c.bf16 %v1604_v5, %v1603_v33  ;;  %v1543_v45 = vadd.f32 %v2309_v36, %v2895_v42  ;;  %v1534_v6 = vpop.f32.mrb[57].mxu0 }
 0x65b   : > { %v1535_v56 = vadd.f32 %v2895_v42, %v1534_v6  ;;  %v2310_v60 = vpop.f32.mrb[58].mxu0  ;;  %v1615_v38 = vpack.c.bf16 %v1602_v44, %v1601_v35 }
 0x65c   : > { %v1575_v39 = vmax.f32 %v1543_v45, 0.0  ;;  %v1546_v3 = vadd.f32 %v2310_v60, %v2895_v42  ;;  %v1537_v43 = vpop.f32.mrb[59].mxu0 }
 0x65d   : > { %v1573_v41 = vmax.f32 %v1535_v56, 0.0  ;;  %v1538_v46 = vadd.f32 %v2895_v42, %v1537_v43  ;;  %2335 = vmatprep.mubr.bf16.mxu1 %v1615_v38 }
 0x65e   : > { %v1607_v12 = vadd.f32 %v1591_v57, %v1575_v39  ;;  %v1576_v0 = vmax.f32 %v1546_v3, 0.0  ;;  %2336 = vmatmul.mubr.bf16.vlgmr.msra.gmra.mrb[48].mxu1 %v1616_v37 }
 0x65f   : > { %v1605_v61 = vadd.f32 %v1589_v4, %v1573_v41  ;;  %v1574_v47 = vmax.f32 %v1538_v46, 0.0 }
 0x660   : > { %v1608_v51 = vadd.f32 %v1592_v40, %v1576_v0 }
 0x661   : > { %v1606_v52 = vadd.f32 %v1590_v48, %v1574_v47  ;;  %v2313_v55 = vpop.f32.mrb[60].mxu0 }
 0x662   : > { %v1559_v49 = vadd.f32 %v2313_v55, %v2895_v42  ;;  %v1550_v58 = vpop.f32.mrb[61].mxu0  ;;  %v1618_v1 = vpack.c.bf16 %v1608_v51, %v1607_v12 }
 0x663   : > { %v1551_v2 = vadd.f32 %v2895_v42, %v1550_v58  ;;  %v2314_v23 = vpop.f32.mrb[62].mxu0  ;;  %v1617_v50 = vpack.c.bf16 %v1606_v52, %v1605_v61 }
 0x664   : > { %v1579_v7 = vmax.f32 %v1559_v49, 0.0  ;;  %v1562_v17 = vadd.f32 %v2314_v23, %v2895_v42  ;;  %v1553_v26 = vpop.f32.mrb[63].mxu0 }
 0x665   : > { %v1577_v9 = vmax.f32 %v1551_v2, 0.0  ;;  %v1554_v62 = vadd.f32 %v2895_v42, %v1553_v26  ;;  %2339 = vmatprep.mubr.bf16.mxu1 %v1617_v50  ;;  %v1966_v42 = vld [vmem:[%s3007_s2 + $0x7] ss:$0 sm:$0xff] }
 0x666   : > { %v1611_v10 = vadd.f32 %v1595_v8, %v1579_v7  ;;  %v1580_v11 = vmax.f32 %v1562_v17, 0.0  ;;  %2340 = vmatmul.mubr.bf16.gmra.mrb[52].mxu1 %v1618_v1 }
 0x667   : > { %v1609_v14 = vadd.f32 %v1593_v18, %v1577_v9  ;;  %v1578_v15 = vmax.f32 %v1554_v62, 0.0 }
 0x668   : > { %v1612_v59 = vadd.f32 %v1596_v13, %v1580_v11 }
 0x669   : > { %v1610_v19 = vadd.f32 %v1594_v16, %v1578_v15 }
 0x66a   : > { %v1620_v20 = vpack.c.bf16 %v1612_v59, %v1611_v10 }
 0x66b   : > { %v1619_v21 = vpack.c.bf16 %v1610_v19, %v1609_v14 }
 0x66d   : > { %2343 = vmatprep.mubr.bf16.mxu1 %v1619_v21 }
 0x66e   : > { %2344 = vmatmul.mubr.bf16.gmra.mrb[56].mxu1 %v1620_v20 }
 0x729   : > { %v2333_v22 = vpop.f32.mrb[64].mxu0 }
 0x72a   : > { %v1734_v31 = vadd.f32 %v2333_v22, %v1966_v42  ;;  %v1725_v27 = vpop.f32.mrb[65].mxu0 }
 0x72b   : > { %v1726_v53 = vadd.f32 %v1966_v42, %v1725_v27  ;;  %v2334_v28 = vpop.f32.mrb[66].mxu0 }
 0x72c   : > { %1790 = vst [vmem:[%s2935_s24 + $0x10] sm:$0xff] %v1734_v31  ;;  %v1737_v32 = vadd.f32 %v2334_v28, %v1966_v42  ;;  %v1728_v29 = vpop.f32.mrb[67].mxu0 }
 0x72d   : > { %1788 = vst [vmem:[%s2935_s24] sm:$0xff] %v1726_v53  ;;  %v1729_v54 = vadd.f32 %v1966_v42, %v1728_v29 }
 0x72e   : > { %1791 = vst [vmem:[%s2935_s24 + $0x18] sm:$0xff] %v1737_v32 }
 0x72f   : > { %1789 = vst [vmem:[%s2935_s24 + $0x8] sm:$0xff] %v1729_v54 }
 0x731   : > { %v2337_v30 = vpop.f32.mrb[48].mxu1 }
 0x732   : > { %v1750_v33 = vadd.f32 %v2337_v30, %v1966_v42  ;;  %v1741_v34 = vpop.f32.mrb[49].mxu1 }
 0x733   : > { %v1742_v24 = vadd.f32 %v1966_v42, %v1741_v34  ;;  %v2338_v35 = vpop.f32.mrb[50].mxu1 }
 0x734   : > { %1794 = vst [vmem:[%s2935_s24 + $0x30] sm:$0xff] %v1750_v33  ;;  %v1753_v25 = vadd.f32 %v2338_v35, %v1966_v42  ;;  %v1744_v63 = vpop.f32.mrb[51].mxu1 }
 0x735   : > { %1792 = vst [vmem:[%s2935_s24 + $0x20] sm:$0xff] %v1742_v24  ;;  %v1745_v5 = vadd.f32 %v1966_v42, %v1744_v63 }
 0x736   : > { %1795 = vst [vmem:[%s2935_s24 + $0x38] sm:$0xff] %v1753_v25 }
 0x737   : > { %1793 = vst [vmem:[%s2935_s24 + $0x28] sm:$0xff] %v1745_v5 }
 0x739   : > { %v2341_v44 = vpop.f32.mrb[52].mxu1 }
 0x73a   : > { %v1766_v36 = vadd.f32 %v2341_v44, %v1966_v42  ;;  %v1757_v37 = vpop.f32.mrb[53].mxu1 }
 0x73b   : > { %v1758_v45 = vadd.f32 %v1966_v42, %v1757_v37  ;;  %v2342_v6 = vpop.f32.mrb[54].mxu1 }
 0x73c   : > { %1798 = vst [vmem:[%s2935_s24 + $0x50] sm:$0xff] %v1766_v36  ;;  %v1769_v56 = vadd.f32 %v2342_v6, %v1966_v42  ;;  %v1760_v60 = vpop.f32.mrb[55].mxu1 }
 0x73d   : > { %1796 = vst [vmem:[%s2935_s24 + $0x40] sm:$0xff] %v1758_v45  ;;  %v1761_v38 = vadd.f32 %v1966_v42, %v1760_v60 }
 0x73e   : > { %1799 = vst [vmem:[%s2935_s24 + $0x58] sm:$0xff] %v1769_v56 }
 0x73f   : > { %1797 = vst [vmem:[%s2935_s24 + $0x48] sm:$0xff] %v1761_v38 }
 0x741   : > { %v2345_v39 = vpop.f32.mrb[56].mxu1 }
 0x742   : > { %v1782_v57 = vadd.f32 %v2345_v39, %v1966_v42  ;;  %v1773_v3 = vpop.f32.mrb[57].mxu1 }
 0x743   : > { %v1774_v43 = vadd.f32 %v1966_v42, %v1773_v3  ;;  %v2346_v41 = vpop.f32.mrb[58].mxu1 }
 0x744   : > { %1802 = vst [vmem:[%s2935_s24 + $0x70] sm:$0xff] %v1782_v57  ;;  %v1785_v4 = vadd.f32 %v2346_v41, %v1966_v42  ;;  %v1776_v46 = vpop.f32.mrb[59].mxu1 }
 0x745   : > { %1800 = vst [vmem:[%s2935_s24 + $0x60] sm:$0xff] %v1774_v43  ;;  %v1777_v12 = vadd.f32 %v1966_v42, %v1776_v46 }
 0x746   : > { %1803 = vst [vmem:[%s2935_s24 + $0x78] sm:$0xff] %v1785_v4 }
 0x747   : > { %1801 = vst [vmem:[%s2935_s24 + $0x68] sm:$0xff] %v1777_v12 }
 0x748   : > { %2516 = shalt.err (!%p2513_p7)
}
 0x749   : > { %s2517_s10 = scalar_lea.hbm %s2955_s5, 2048  ;;  %s2521_s19 = scalar_lea.hbm %s3008_s3, 4096 }
 0x74a   : > { %p2518_p8 = scmp.ne.s32.totalorder %s2955_s5, %s2517_s10  ;;  %p2522_p1 = scmp.lt.u32.totalorder %s2955_s5, %s3008_s3 }
 0x74b   : > { %p2523_p0 = scmp.lt.u32.totalorder %s2521_s19, %s2517_s10  ;;  %p2525_p6 = scmp.lt.u32.totalorder %s2517_s10, %s2955_s5 }
 0x74c   : > { %p2519_p11 = pnand %p2518_p8, %p3019_p9 }
 0x74d   : > { %p2524_p5 = por %p2523_p0, %p2522_p1 }
 0x74e   : > { %p2520_p13 = pneg %p2519_p11 }
 0x74f   : > { %p2526_p10 = por %p2525_p6, %p2524_p5 }
 0x751   : > { %p2527_p12 = pnand %p2526_p10, %p2520_p13 }
 0x753   : > { %2530 = shalt.err (!%p2527_p12)
}
 0x754   : > { %s2575_s27 = smov 128   ;;  %s2576_s28 = smov 8  }
 0x755   : > { %2367 = dma.vmem_to_hbm [thread:$0]  (%p3019_p9), %s2957_s29, 2048, %s2955_s5, %s2964_s16, %s2575_s27, %s2575_s27, %s2576_s28  }
 0x756 PF: > { %p2379_p2 = scmp.ge.s32.totalorder %s2569_s15, 2  ;;  %s1833_s24 = sand.u32 1, %s2557_s12  }
 0x757   : > { %p3020_p3 = scmp.ne.s32.totalorder %s3013_s23, 0  ;;  %s1834_s26 = scalar_lea.sflag [#allocation4], %s1833_s24 }
 0x759   : > { %p2374_p4 = pnand %p2379_p2, %p3020_p3 }
 0x75b   : > { %2552 = dma.done.wait (!%p2374_p4), %s1834_s26, 2048  }
 0x75c   : > { %2554 = vsyncadd (!%p2374_p4), %s1834_s26, 4294965248  ;;  %p14_p7 = scmp.ge.s32.totalorder %s2622_s18, 4   ;;  %s3021_s12 = smov %s2561_s13 }
 0x75d   : > { %s3022_s13 = smov %s2565_s14  ;;  %s3023_s14 = smov %s2633_s21 }
 0x75e   : > { %s3024_s15 = smov %s2622_s18  ;;  %16 = sbr.rel (!%p14_p7) target bundleno = 4 (0x4), region = 79 }
 0x765   :  { %1839 = vsyncpa [#allocation3], 1 }
 0x766   :  { %1841 = vsyncpa [#allocation3 + $0x1], 1 }
 0x767   :  { %1842 = vsyncpa [#allocation4], 1 }
 0x768   :  { %1844 = vsyncpa [#allocation4 + $0x1], 1 }

</bundles_post_ra>
